<compile_context>
chip_gen: v7x
topology: tpu7x:2x2x1
jax: 0.10.0
libtpu: 0.0.40
codegen_flags: <defaults>
</compile_context>

<pallas_src>
import functools

import jax
import jax.numpy as jnp
import numpy as np
from jax.experimental import pallas as pl
from jax.experimental.pallas import tpu as pltpu


# ---------------------------------------------------------------------------
# Hardware-aware sizing helpers
# ---------------------------------------------------------------------------
@functools.lru_cache(maxsize=None)
def _vmem_limit_bytes():
    """Scoped-VMEM limit: ~3/4 of physical VMEM (96 MiB on v5e/v6e, 48 MiB on v7x)."""
    cap = 128 * 1024 * 1024
    try:
        cap = int(getattr(pltpu.get_tpu_info(), "vmem_capacity_bytes", cap))
    except Exception:
        pass
    return max(16 * 1024 * 1024, min((cap * 3) // 4, 96 * 1024 * 1024))


def _pick_pixel_tile(P, N, per_pixel_bytes, budget, max_tp=4096):
    """Pixel tile (lane dim): multiple of 128 (or == P), fits budget, keeps >= 4 grid steps."""
    if P <= 128:
        return P
    tp = max(128, (budget // max(per_pixel_bytes, 1)) // 128 * 128)
    tp = min(P, max_tp, tp)
    # >= 4 total steps when possible so both v7x TensorCores get >= 2 iterations each.
    while N * pl.cdiv(P, tp) < 4 and tp > 128:
        tp = max(128, (tp // 2) // 128 * 128)
    return tp


def _pick_spatial_blocks(C, m, dt_bytes, budget, N, cblk=None, ti=None):
    """Channel-block / row-block sizes for the batched spatial matmul."""
    if cblk is None:
        cblk = min(C, 128)
        while cblk > 8 and 6 * cblk * m * m * dt_bytes > budget:   # 3 live blocks x 2 buffers
            cblk = max(8, cblk // 2)
        while cblk > 8 and N * pl.cdiv(C, cblk) < 4:               # >= 2 steps per v7x core
            cblk = max(8, cblk // 2)
    else:
        cblk = max(1, min(cblk, C))
    if ti is None:
        ti = m
        while (ti > 8 and ti % 16 == 0
               and 2 * (2 * cblk * ti * m + cblk * m * m) * dt_bytes > budget):
            ti //= 2
    else:
        ti = max(1, min(ti, m))
        if ti != m and ti % 8 != 0:
            ti = m   # keep block shape legal: 2nd-to-last dim must be /8 or == full dim
    return cblk, ti


# ---------------------------------------------------------------------------
# Kernels
# ---------------------------------------------------------------------------
def _fused_mlps_kernel(*refs, depth, Cout, mm_dtype):
    """Both MlpBlock branches, channel-major.  Block views:
       x: (Cin, tp)   w0: (2*Cout, Cin)   b0: (2*Cout, 1)
       deep w: (Cout, Cout)   deep b: (Cout, 1)   mask: (1, tp)   o1/o2: (Cout, tp)
    """
    nd = depth - 1
    x_ref, w0_ref, b0_ref = refs[0], refs[1], refs[2]
    deep = refs[3:3 + 4 * nd]
    w1, b1 = deep[0:2 * nd:2], deep[1:2 * nd:2]
    w2, b2 = deep[2 * nd::2], deep[2 * nd + 1::2]
    m_ref, o1_ref, o2_ref = refs[3 + 4 * nd], refs[4 + 4 * nd], refs[5 + 4 * nd]

    x = x_ref[...].astype(mm_dtype)                      # (Cin, tp)
    msk = m_ref[...]                                     # (1, tp), broadcast over channels

    # Layer 0 of BOTH branches as a single packed MXU matmul (best use of tiny K=Cin).
    h0 = jnp.dot(w0_ref[...], x, preferred_element_type=jnp.float32) + b0_ref[...]
    h0 = jnp.maximum(h0, 0.0)                            # relu_ after every 1x1 conv

    def deep_mlp(h, ws, bs):
        for w_ref, b_ref in zip(ws, bs):
            h = jnp.dot(w_ref[...], h.astype(mm_dtype),
                        preferred_element_type=jnp.float32) + b_ref[...]
            h = jnp.maximum(h, 0.0)
        return h

    h1 = deep_mlp(h0[:Cout, :], w1, b1)
    h2 = deep_mlp(h0[Cout:, :], w2, b2)
    o1_ref[...] = (h1 * msk).astype(o1_ref.dtype)
    o2_ref[...] = (h2 * msk).astype(o2_ref.dtype)


def _spatial_kernel(a_ref, b_ref, o_ref, *, use_mxu):
    """mult[c, i, j] = sum_k mlp1[c, i, k] * mlp2[c, k, j] for one (image, channel-block,
    row-block).  a: (cblk, ti, m)   b: (cblk, m, m)   o: (cblk, ti, m)."""
    a = a_ref[...]
    b = b_ref[...]
    if use_mxu:
        # Batch-leading batched matmul -> one MXU matmul per channel in the block.
        mult = jnp.einsum('cik,ckj->cij', a, b, preferred_element_type=jnp.float32)
    else:
        # Tiny-m VPU fallback: 2 partial accumulators break the serial-add dependency.
        af = a.astype(jnp.float32)
        bf = b.astype(jnp.float32)
        kdim = bf.shape[1]
        acc0 = af[:, :, 0:1] * bf[:, 0:1, :]
        acc1 = jnp.zeros_like(acc0)
        for k in range(1, kdim):
            term = af[:, :, k:k + 1] * bf[:, k:k + 1, :]
            if k % 2 == 0:
                acc0 = acc0 + term
            else:
                acc1 = acc1 + term
        mult = acc0 + acc1
    o_ref[...] = mult.astype(o_ref.dtype)


def _skip_kernel(x_ref, mult_ref, wx_ref, wm_ref, b_ref, m_ref, o_ref, *, mm_dtype):
    """Concat-free SkipConnection in channel-major orientation:
       out = (wx^T @ x + wm^T @ mult + b) * mask,  x: (Cin, tp), mult: (Cout, tp)."""
    y = jnp.dot(wx_ref[...], x_ref[...].astype(mm_dtype),
                preferred_element_type=jnp.float32)
    y = y + jnp.dot(wm_ref[...], mult_ref[...].astype(mm_dtype),
                    preferred_element_type=jnp.float32)
    y = (y + b_ref[...]) * m_ref[...]
    o_ref[...] = y.astype(o_ref.dtype)


# ---------------------------------------------------------------------------
# Pallas wrappers
# ---------------------------------------------------------------------------
def fused_mlps(x_cm, mask_cm, w0_t, b0_c, w1_deep, b1_deep, w2_deep, b2_deep,
               *, out_dtype, mm_dtype, vmem_limit):
    """x_cm: (N, Cin, P), mask_cm: (N, 1, P) -> (mlp1, mlp2) each (N, Cout, P)."""
    N, Cin, P = x_cm.shape
    Cout = w0_t.shape[0] // 2
    depth = 1 + len(w1_deep)
    xb = jnp.dtype(x_cm.dtype).itemsize
    ob = jnp.dtype(out_dtype).itemsize
    per_pixel = 2 * (Cin * xb + 4 + 2 * Cout * ob) + 16 * Cout   # blocks (x2 buf) + f32 temps
    tp = _pick_pixel_tile(P, N, per_pixel, vmem_limit // 2)
    grid = (N, pl.cdiv(P, tp))

    weights = [w0_t, b0_c]
    for w, b in list(zip(w1_deep, b1_deep)) + list(zip(w2_deep, b2_deep)):
        weights += [w, b]

    in_specs = [pl.BlockSpec((None, Cin, tp), lambda n, p: (n, 0, p))]
    in_specs += [pl.BlockSpec(w.shape, lambda n, p: (0, 0)) for w in weights]
    in_specs += [pl.BlockSpec((None, 1, tp), lambda n, p: (n, 0, p))]
    out_spec = pl.BlockSpec((None, Cout, tp), lambda n, p: (n, 0, p))

    wbytes = sum(int(np.prod(w.shape)) * jnp.dtype(w.dtype).itemsize for w in weights)
    flops = 2 * N * P * (Cin * 2 * Cout + (depth - 1) * 2 * Cout * Cout)
    bytes_acc = N * P * (Cin * xb + 4 + 2 * Cout * ob) + wbytes   # weights counted once

    return pl.pallas_call(
        functools.partial(_fused_mlps_kernel, depth=depth, Cout=Cout, mm_dtype=mm_dtype),
        out_shape=(jax.ShapeDtypeStruct((N, Cout, P), out_dtype),
                   jax.ShapeDtypeStruct((N, Cout, P), out_dtype)),
        grid=grid,
        in_specs=in_specs,
        out_specs=(out_spec, out_spec),
        compiler_params=pltpu.CompilerParams(
            dimension_semantics=("parallel", "parallel"), vmem_limit_bytes=vmem_limit),
        cost_estimate=pl.CostEstimate(flops=int(flops), transcendentals=0,
                                      bytes_accessed=int(bytes_acc)),
    )(x_cm, *weights, mask_cm)


def spatial_mult(a_nc, b_nc, *, out_dtype, vmem_limit, cblk=None, ti=None, use_mxu=None):
    """Channel-major batched spatial matmul: (N, C, m, m) x (N, C, m, m) -> (N, C, m, m)."""
    N, C, m, _ = a_nc.shape
    dtb = jnp.dtype(a_nc.dtype).itemsize
    cblk, ti = _pick_spatial_blocks(C, m, dtb, vmem_limit // 2, N, cblk, ti)
    if use_mxu is None:
        use_mxu = m >= 8     # VPU broadcast-MAC fallback only pays for very small m
    grid = (N, pl.cdiv(C, cblk), pl.cdiv(m, ti))

    a_spec = pl.BlockSpec((None, cblk, ti, m), lambda n, c, i: (n, c, i, 0))
    b_spec = pl.BlockSpec((None, cblk, m, m), lambda n, c, i: (n, c, 0, 0))
    o_spec = pl.BlockSpec((None, cblk, ti, m), lambda n, c, i: (n, c, i, 0))

    flops = 2 * N * C * m * m * m
    bytes_acc = 3 * N * C * m * m * dtb
    return pl.pallas_call(
        functools.partial(_spatial_kernel, use_mxu=use_mxu),
        out_shape=jax.ShapeDtypeStruct((N, C, m, m), out_dtype),
        grid=grid,
        in_specs=[a_spec, b_spec],
        out_specs=o_spec,
        compiler_params=pltpu.CompilerParams(
            dimension_semantics=("parallel", "parallel", "parallel"),
            vmem_limit_bytes=vmem_limit),
        cost_estimate=pl.CostEstimate(flops=int(flops), transcendentals=0,
                                      bytes_accessed=int(bytes_acc)),
    )(a_nc, b_nc)


def skip_connection(x_cm, mult_cm, mask_cm, wx_t, wm_t, b_c, *, out_dtype, mm_dtype,
                    vmem_limit):
    """Concat-free skip: (N, Cin, P), (N, Cout, P) -> (N, Cout, P), masked."""
    N, Cin, P = x_cm.shape
    Cout = wx_t.shape[0]
    xb = jnp.dtype(x_cm.dtype).itemsize
    mb = jnp.dtype(mult_cm.dtype).itemsize
    ob = jnp.dtype(out_dtype).itemsize
    per_pixel = 2 * (Cin * xb + 4 + Cout * (mb + ob)) + 4 * Cout
    tp = _pick_pixel_tile(P, N, per_pixel, vmem_limit // 2)
    grid = (N, pl.cdiv(P, tp))

    wbytes = sum(int(np.prod(w.shape)) * jnp.dtype(w.dtype).itemsize
                 for w in (wx_t, wm_t, b_c))
    flops = 2 * N * P * (Cin + Cout) * Cout
    bytes_acc = N * P * (Cin * xb + Cout * mb + Cout * ob + 4) + wbytes

    return pl.pallas_call(
        functools.partial(_skip_kernel, mm_dtype=mm_dtype),
        out_shape=jax.ShapeDtypeStruct((N, Cout, P), out_dtype),
        grid=grid,
        in_specs=[
            pl.BlockSpec((None, Cin, tp), lambda n, p: (n, 0, p)),
            pl.BlockSpec((None, Cout, tp), lambda n, p: (n, 0, p)),
            pl.BlockSpec(wx_t.shape, lambda n, p: (0, 0)),
            pl.BlockSpec(wm_t.shape, lambda n, p: (0, 0)),
            pl.BlockSpec(b_c.shape, lambda n, p: (0, 0)),
            pl.BlockSpec((None, 1, tp), lambda n, p: (n, 0, p)),
        ],
        out_specs=pl.BlockSpec((None, Cout, tp), lambda n, p: (n, 0, p)),
        compiler_params=pltpu.CompilerParams(
            dimension_semantics=("parallel", "parallel"), vmem_limit_bytes=vmem_limit),
        cost_estimate=pl.CostEstimate(flops=int(flops), transcendentals=0,
                                      bytes_accessed=int(bytes_acc)),
    )(x_cm, mult_cm, wx_t, wm_t, b_c, mask_cm)


# ---------------------------------------------------------------------------
# RegularBlock forward (glue + kernels)
# ---------------------------------------------------------------------------
def regular_block_forward(x, mask, params, *, use_bf16=False,
                          spatial_cblk=None, spatial_ti=None, spatial_use_mxu=None):
    """x: (N, Cin, m, m) NCHW, mask: (N, m, m).  Returns (N, Cout, m, m) NCHW."""
    N, Cin, m, _ = x.shape
    Cout = params['w1'][-1].shape[1]
    P = m * m

    # bf16 matmul-input fast path is valid on v5e / v6e / v7x (MXU is natively bf16);
    # matmuls accumulate in f32, elementwise stays f32.  Note: mlp1/mlp2/mult are also
    # *stored* in HBM as bf16 in this path (halves their traffic, slightly wider error).
    inter_dtype = jnp.bfloat16 if use_bf16 else x.dtype
    mm_dtype = jnp.bfloat16 if use_bf16 else jnp.float32
    vmem_limit = _vmem_limit_bytes()

    # Channel-major (NCHW-native) views: pure metadata reshapes, no transposes anywhere.
    x_cm = x.reshape(N, Cin, P)
    mask_cm = mask.astype(jnp.float32).reshape(N, 1, P)

    # Pre-transpose / pre-cast the tiny weights once in the wrapper (resident in VMEM).
    w1s, b1s, w2s, b2s = params['w1'], params['b1'], params['w2'], params['b2']
    w0_t = jnp.concatenate([w1s[0], w2s[0]], axis=1).T.astype(mm_dtype)   # (2*Cout, Cin)
    b0_c = jnp.concatenate([b1s[0], b2s[0]], axis=1).T                     # (2*Cout, 1) f32
    w1_deep = [w.T.astype(mm_dtype) for w in w1s[1:]]
    b1_deep = [b.T for b in b1s[1:]]
    w2_deep = [w.T.astype(mm_dtype) for w in w2s[1:]]
    b2_deep = [b.T for b in b2s[1:]]
    wx_t = params['ws'][:Cin].T.astype(mm_dtype)                           # (Cout, Cin)
    wm_t = params['ws'][Cin:].T.astype(mm_dtype)                           # (Cout, Cout)
    bs_c = params['bs'].T                                                  # (Cout, 1)

    # Both MLP branches in one fused kernel (x/mask read once, layer-0 packed).
    mlp1, mlp2 = fused_mlps(x_cm, mask_cm, w0_t, b0_c, w1_deep, b1_deep, w2_deep, b2_deep,
                            out_dtype=inter_dtype, mm_dtype=mm_dtype, vmem_limit=vmem_limit)

    # Spatial matmul on the MXU (per-channel (m,m)@(m,m)), channel/row blocked.
    mult = spatial_mult(mlp1.reshape(N, Cout, m, m), mlp2.reshape(N, Cout, m, m),
                        out_dtype=inter_dtype, vmem_limit=vmem_limit,
                        cblk=spatial_cblk, ti=spatial_ti, use_mxu=spatial_use_mxu)

    # Concat-free skip connection; output is already NCHW.
    out_cm = skip_connection(x_cm, mult.reshape(N, Cout, P), mask_cm, wx_t, wm_t, bs_c,
                             out_dtype=x.dtype, mm_dtype=mm_dtype, vmem_limit=vmem_limit)
    return out_cm.reshape(N, Cout, m, m)


# ---------------------------------------------------------------------------
# Pure-JAX reference (for correctness check)
# ---------------------------------------------------------------------------
def regular_block_reference(x, mask, params):
    mk = mask[:, None].astype(x.dtype)  # (N, 1, m, m)

    def conv(h, w, b):  # w: (Cin, Cout), b: (1, Cout)
        return jnp.einsum('ncij,co->noij', h, w) + b[0][None, :, None, None]

    def mlp(h, ws, bs):
        for w, b in zip(ws, bs):
            h = jnp.maximum(conv(h, w, b), 0.0)
        return h

    m1 = mlp(x, params['w1'], params['b1']) * mk
    m2 = mlp(x, params['w2'], params['b2']) * mk
    mult = jnp.einsum('ncik,nckj->ncij', m1, m2)
    cat = jnp.concatenate([x, mult], axis=1)
    return conv(cat, params['ws'], params['bs']) * mk


# ---------------------------------------------------------------------------
# Deterministic parameter init (shapes from RegularBlock.__init__)
# ---------------------------------------------------------------------------
def init_params(key, in_features, out_features, depth_of_mlp=2):
    def linear_init(k, fan_in, fan_out):
        kw, kb = jax.random.split(k)
        scale = 1.0 / np.sqrt(fan_in)
        w = jax.random.uniform(kw, (fan_in, fan_out), jnp.float32, -scale, scale)
        b = jax.random.uniform(kb, (1, fan_out), jnp.float32, -scale, scale)
        return w, b

    keys = jax.random.split(key, 2 * depth_of_mlp + 1)
    params = {'w1': [], 'b1': [], 'w2': [], 'b2': []}
    cin = in_features
    for d in range(depth_of_mlp):
        w, b = linear_init(keys[d], cin, out_features)
        params['w1'].append(w); params['b1'].append(b)
        w, b = linear_init(keys[depth_of_mlp + d], cin, out_features)
        params['w2'].append(w); params['b2'].append(b)
        cin = out_features
    ws, bs = linear_init(keys[-1], in_features + out_features, out_features)
    params['ws'] = ws
    params['bs'] = bs
    return params


if __name__ == "__main__":
    N, C_IN, C_OUT, M = 2, 4, 32, 16

    key = jax.random.PRNGKey(0)
    k_x, k_m, k_p = jax.random.split(key, 3)

    x = jax.random.normal(k_x, (N, C_IN, M, M), dtype=jnp.float32)
    mask = (jax.random.uniform(k_m, (N, M, M)) > 0.3).astype(jnp.float32)
    params = init_params(k_p, C_IN, C_OUT, depth_of_mlp=2)

    ref = regular_block_reference(x, mask, params)

    # 1) f32 path, MXU spatial matmul with auto channel/row blocking.
    out = jax.block_until_ready(jax.jit(regular_block_forward)(x, mask, params))
    np.testing.assert_allclose(np.asarray(out), np.asarray(ref), rtol=1e-4, atol=1e-4)
    assert out.shape == (N, C_OUT, M, M)

    # 2) f32 path, forced small channel/row blocks (exercises the blocking machinery).
    out_blk = jax.block_until_ready(
        jax.jit(functools.partial(regular_block_forward, spatial_cblk=8, spatial_ti=8))(
            x, mask, params))
    np.testing.assert_allclose(np.asarray(out_blk), np.asarray(ref), rtol=1e-4, atol=1e-4)

    # 3) f32 path, small-m VPU fallback for the spatial contraction.
    out_vpu = jax.block_until_ready(
        jax.jit(functools.partial(regular_block_forward, spatial_use_mxu=False))(
            x, mask, params))
    np.testing.assert_allclose(np.asarray(out_vpu), np.asarray(ref), rtol=1e-4, atol=1e-4)

    # 4) bf16 matmul-input fast path (f32 accumulation, looser tolerance).
    out_bf16 = jax.block_until_ready(
        jax.jit(functools.partial(regular_block_forward, use_bf16=True))(x, mask, params))
    np.testing.assert_allclose(np.asarray(out_bf16), np.asarray(ref), rtol=5e-2, atol=5e-2)

    print("KERNEL_OK")
</pallas_src>

<mosaic_0001>
module attributes {stable_mosaic.version = 11 : i64} {
  func.func @_fused_mlps_kernel(%arg0: i32, %arg1: i32, %arg2: memref<1x4x128xf32, #tpu.memory_space<vmem>>, %arg3: memref<64x4xf32, #tpu.memory_space<vmem>>, %arg4: memref<64x1xf32, #tpu.memory_space<vmem>>, %arg5: memref<32x32xf32, #tpu.memory_space<vmem>>, %arg6: memref<32x1xf32, #tpu.memory_space<vmem>>, %arg7: memref<32x32xf32, #tpu.memory_space<vmem>>, %arg8: memref<32x1xf32, #tpu.memory_space<vmem>>, %arg9: memref<1x1x128xf32, #tpu.memory_space<vmem>>, %arg10: memref<1x32x128xf32, #tpu.memory_space<vmem>>, %arg11: memref<1x32x128xf32, #tpu.memory_space<vmem>>) attributes {dimension_semantics = [#tpu.dimension_semantics<parallel>, #tpu.dimension_semantics<parallel>], iteration_bounds = array<i64: 2, 2>, scalar_prefetch = 0 : i64, scratch_operands = 0 : i64, tpu.core_type = #tpu.core_type<tc>, window_params = [{transform_indices = @transform_0, window_bounds = array<i64: 1, 4, 128>}, {pipeline_mode = #tpu.pipeline_mode<synchronous>, transform_indices = @transform_1, window_bounds = array<i64: 64, 4>}, {pipeline_mode = #tpu.pipeline_mode<synchronous>, transform_indices = @transform_2, window_bounds = array<i64: 64, 1>}, {pipeline_mode = #tpu.pipeline_mode<synchronous>, transform_indices = @transform_3, window_bounds = array<i64: 32, 32>}, {pipeline_mode = #tpu.pipeline_mode<synchronous>, transform_indices = @transform_4, window_bounds = array<i64: 32, 1>}, {pipeline_mode = #tpu.pipeline_mode<synchronous>, transform_indices = @transform_5, window_bounds = array<i64: 32, 32>}, {pipeline_mode = #tpu.pipeline_mode<synchronous>, transform_indices = @transform_6, window_bounds = array<i64: 32, 1>}, {transform_indices = @transform_7, window_bounds = array<i64: 1, 1, 128>}, {transform_indices = @transform_8, window_bounds = array<i64: 1, 32, 128>}, {transform_indices = @transform_9, window_bounds = array<i64: 1, 32, 128>}]} {
    %c0 = arith.constant 0 : index
    %c0_0 = arith.constant 0 : index
    %c0_1 = arith.constant 0 : index
    %0 = vector.load %arg2[%c0, %c0_0, %c0_1] : memref<1x4x128xf32, #tpu.memory_space<vmem>>, vector<1x4x128xf32>
    %1 = vector.shape_cast %0 : vector<1x4x128xf32> to vector<4x128xf32>
    %c0_2 = arith.constant 0 : index
    %c0_3 = arith.constant 0 : index
    %c0_4 = arith.constant 0 : index
    %2 = vector.load %arg9[%c0_2, %c0_3, %c0_4] : memref<1x1x128xf32, #tpu.memory_space<vmem>>, vector<1x1x128xf32>
    %3 = vector.shape_cast %2 : vector<1x1x128xf32> to vector<1x128xf32>
    %c0_5 = arith.constant 0 : index
    %c0_6 = arith.constant 0 : index
    %4 = vector.load %arg3[%c0_5, %c0_6] : memref<64x4xf32, #tpu.memory_space<vmem>>, vector<64x4xf32>
    %cst = arith.constant dense<0.000000e+00> : vector<64x128xf32>
    %5 = tpu.matmul %4, %1, %cst {dimension_numbers = #tpu.dot_dimension_numbers<[1], [0], [0], [1], [0, 0, 1, 1], [], []>} : vector<64x4xf32>, vector<4x128xf32>, vector<64x128xf32> -> vector<64x128xf32>
    %c0_7 = arith.constant 0 : index
    %c0_8 = arith.constant 0 : index
    %6 = vector.load %arg4[%c0_7, %c0_8] : memref<64x1xf32, #tpu.memory_space<vmem>>, vector<64x1xf32>
    %7 = vector.broadcast %6 : vector<64x1xf32> to vector<64x128xf32>
    %8 = arith.addf %5, %7 : vector<64x128xf32>
    %cst_9 = arith.constant 0.000000e+00 : f32
    %9 = vector.broadcast %cst_9 : f32 to vector<64x128xf32>
    %10 = arith.maximumf %8, %9 : vector<64x128xf32>
    %11 = vector.extract_strided_slice %10 {offsets = [0, 0], sizes = [32, 128], strides = [1, 1]} : vector<64x128xf32> to vector<32x128xf32>
    %c0_10 = arith.constant 0 : index
    %c0_11 = arith.constant 0 : index
    %12 = vector.load %arg5[%c0_10, %c0_11] : memref<32x32xf32, #tpu.memory_space<vmem>>, vector<32x32xf32>
    %cst_12 = arith.constant dense<0.000000e+00> : vector<32x128xf32>
    %13 = tpu.matmul %12, %11, %cst_12 {dimension_numbers = #tpu.dot_dimension_numbers<[1], [0], [0], [1], [0, 0, 1, 1], [], []>} : vector<32x32xf32>, vector<32x128xf32>, vector<32x128xf32> -> vector<32x128xf32>
    %c0_13 = arith.constant 0 : index
    %c0_14 = arith.constant 0 : index
    %14 = vector.load %arg6[%c0_13, %c0_14] : memref<32x1xf32, #tpu.memory_space<vmem>>, vector<32x1xf32>
    %15 = vector.broadcast %14 : vector<32x1xf32> to vector<32x128xf32>
    %16 = arith.addf %13, %15 : vector<32x128xf32>
    %cst_15 = arith.constant 0.000000e+00 : f32
    %17 = vector.broadcast %cst_15 : f32 to vector<32x128xf32>
    %18 = arith.maximumf %16, %17 : vector<32x128xf32>
    %19 = vector.extract_strided_slice %10 {offsets = [32, 0], sizes = [32, 128], strides = [1, 1]} : vector<64x128xf32> to vector<32x128xf32>
    %c0_16 = arith.constant 0 : index
    %c0_17 = arith.constant 0 : index
    %20 = vector.load %arg7[%c0_16, %c0_17] : memref<32x32xf32, #tpu.memory_space<vmem>>, vector<32x32xf32>
    %cst_18 = arith.constant dense<0.000000e+00> : vector<32x128xf32>
    %21 = tpu.matmul %20, %19, %cst_18 {dimension_numbers = #tpu.dot_dimension_numbers<[1], [0], [0], [1], [0, 0, 1, 1], [], []>} : vector<32x32xf32>, vector<32x128xf32>, vector<32x128xf32> -> vector<32x128xf32>
    %c0_19 = arith.constant 0 : index
    %c0_20 = arith.constant 0 : index
    %22 = vector.load %arg8[%c0_19, %c0_20] : memref<32x1xf32, #tpu.memory_space<vmem>>, vector<32x1xf32>
    %23 = vector.broadcast %22 : vector<32x1xf32> to vector<32x128xf32>
    %24 = arith.addf %21, %23 : vector<32x128xf32>
    %cst_21 = arith.constant 0.000000e+00 : f32
    %25 = vector.broadcast %cst_21 : f32 to vector<32x128xf32>
    %26 = arith.maximumf %24, %25 : vector<32x128xf32>
    %27 = vector.broadcast %3 : vector<1x128xf32> to vector<32x128xf32>
    %28 = arith.mulf %18, %27 : vector<32x128xf32>
    %c0_22 = arith.constant 0 : index
    %c0_23 = arith.constant 0 : index
    %c0_24 = arith.constant 0 : index
    %29 = vector.load %arg10[%c0_22, %c0_23, %c0_24] : memref<1x32x128xf32, #tpu.memory_space<vmem>>, vector<1x32x128xf32>
    %30 = vector.shape_cast %29 : vector<1x32x128xf32> to vector<32x128xf32>
    %31 = vector.shape_cast %28 : vector<32x128xf32> to vector<1x32x128xf32>
    tpu.vector_store %arg10[%c0_22, %c0_23, %c0_24], %31 {strides = array<i32>} : memref<1x32x128xf32, #tpu.memory_space<vmem>>, vector<1x32x128xf32>,
    %32 = vector.broadcast %3 : vector<1x128xf32> to vector<32x128xf32>
    %33 = arith.mulf %26, %32 : vector<32x128xf32>
    %c0_25 = arith.constant 0 : index
    %c0_26 = arith.constant 0 : index
    %c0_27 = arith.constant 0 : index
    %34 = vector.load %arg11[%c0_25, %c0_26, %c0_27] : memref<1x32x128xf32, #tpu.memory_space<vmem>>, vector<1x32x128xf32>
    %35 = vector.shape_cast %34 : vector<1x32x128xf32> to vector<32x128xf32>
    %36 = vector.shape_cast %33 : vector<32x128xf32> to vector<1x32x128xf32>
    tpu.vector_store %arg11[%c0_25, %c0_26, %c0_27], %36 {strides = array<i32>} : memref<1x32x128xf32, #tpu.memory_space<vmem>>, vector<1x32x128xf32>,
    return
  }
  func.func @transform_0(%arg0: i32, %arg1: i32) -> (i32, i32, i32) {
    %c0_i32 = arith.constant 0 : i32
    %c0_i32_0 = arith.constant 0 : i32
    return %arg0, %c0_i32, %arg1 : i32, i32, i32
  }
  func.func @transform_1(%arg0: i32, %arg1: i32) -> (i32, i32) {
    %c0_i32 = arith.constant 0 : i32
    %c0_i32_0 = arith.constant 0 : i32
    %c0_i32_1 = arith.constant 0 : i32
    return %c0_i32, %c0_i32_0 : i32, i32
  }
  func.func @transform_2(%arg0: i32, %arg1: i32) -> (i32, i32) {
    %c0_i32 = arith.constant 0 : i32
    %c0_i32_0 = arith.constant 0 : i32
    %c0_i32_1 = arith.constant 0 : i32
    return %c0_i32, %c0_i32_0 : i32, i32
  }
  func.func @transform_3(%arg0: i32, %arg1: i32) -> (i32, i32) {
    %c0_i32 = arith.constant 0 : i32
    %c0_i32_0 = arith.constant 0 : i32
    %c0_i32_1 = arith.constant 0 : i32
    return %c0_i32, %c0_i32_0 : i32, i32
  }
  func.func @transform_4(%arg0: i32, %arg1: i32) -> (i32, i32) {
    %c0_i32 = arith.constant 0 : i32
    %c0_i32_0 = arith.constant 0 : i32
    %c0_i32_1 = arith.constant 0 : i32
    return %c0_i32, %c0_i32_0 : i32, i32
  }
  func.func @transform_5(%arg0: i32, %arg1: i32) -> (i32, i32) {
    %c0_i32 = arith.constant 0 : i32
    %c0_i32_0 = arith.constant 0 : i32
    %c0_i32_1 = arith.constant 0 : i32
    return %c0_i32, %c0_i32_0 : i32, i32
  }
  func.func @transform_6(%arg0: i32, %arg1: i32) -> (i32, i32) {
    %c0_i32 = arith.constant 0 : i32
    %c0_i32_0 = arith.constant 0 : i32
    %c0_i32_1 = arith.constant 0 : i32
    return %c0_i32, %c0_i32_0 : i32, i32
  }
  func.func @transform_7(%arg0: i32, %arg1: i32) -> (i32, i32, i32) {
    %c0_i32 = arith.constant 0 : i32
    %c0_i32_0 = arith.constant 0 : i32
    return %arg0, %c0_i32, %arg1 : i32, i32, i32
  }
  func.func @transform_8(%arg0: i32, %arg1: i32) -> (i32, i32, i32) {
    %c0_i32 = arith.constant 0 : i32
    %c0_i32_0 = arith.constant 0 : i32
    return %arg0, %c0_i32, %arg1 : i32, i32, i32
  }
  func.func @transform_9(%arg0: i32, %arg1: i32) -> (i32, i32, i32) {
    %c0_i32 = arith.constant 0 : i32
    %c0_i32_0 = arith.constant 0 : i32
    return %arg0, %c0_i32, %arg1 : i32, i32, i32
  }
}

module attributes {stable_mosaic.version = 11 : i64} {
  func.func @_spatial_kernel(%arg0: i32, %arg1: i32, %arg2: i32, %arg3: memref<1x16x16x16xf32, #tpu.memory_space<vmem>>, %arg4: memref<1x16x16x16xf32, #tpu.memory_space<vmem>>, %arg5: memref<1x16x16x16xf32, #tpu.memory_space<vmem>>) attributes {dimension_semantics = [#tpu.dimension_semantics<parallel>, #tpu.dimension_semantics<parallel>, #tpu.dimension_semantics<parallel>], iteration_bounds = array<i64: 2, 2, 1>, scalar_prefetch = 0 : i64, scratch_operands = 0 : i64, tpu.core_type = #tpu.core_type<tc>, window_params = [{transform_indices = @transform_0, window_bounds = array<i64: 1, 16, 16, 16>}, {transform_indices = @transform_1, window_bounds = array<i64: 1, 16, 16, 16>}, {transform_indices = @transform_2, window_bounds = array<i64: 1, 16, 16, 16>}]} {
    %c0 = arith.constant 0 : index
    %c0_0 = arith.constant 0 : index
    %c0_1 = arith.constant 0 : index
    %c0_2 = arith.constant 0 : index
    %0 = vector.load %arg3[%c0, %c0_0, %c0_1, %c0_2] : memref<1x16x16x16xf32, #tpu.memory_space<vmem>>, vector<1x16x16x16xf32>
    %1 = vector.shape_cast %0 : vector<1x16x16x16xf32> to vector<16x16x16xf32>
    %c0_3 = arith.constant 0 : index
    %c0_4 = arith.constant 0 : index
    %c0_5 = arith.constant 0 : index
    %c0_6 = arith.constant 0 : index
    %2 = vector.load %arg4[%c0_3, %c0_4, %c0_5, %c0_6] : memref<1x16x16x16xf32, #tpu.memory_space<vmem>>, vector<1x16x16x16xf32>
    %3 = vector.shape_cast %2 : vector<1x16x16x16xf32> to vector<16x16x16xf32>
    "tpu.trace_start"() <{level = 10 : i32, message = "cik,ckj->cij"}> : () -> ()
    %cst = arith.constant dense<0.000000e+00> : vector<16x16x16xf32>
    %4 = tpu.matmul %1, %3, %cst {dimension_numbers = #tpu.dot_dimension_numbers<[2], [1], [1], [2], [0, 0, 0, 1, 1, 2], [0], [0]>} : vector<16x16x16xf32>, vector<16x16x16xf32>, vector<16x16x16xf32> -> vector<16x16x16xf32>
    "tpu.trace_stop"() : () -> ()
    %c0_7 = arith.constant 0 : index
    %c0_8 = arith.constant 0 : index
    %c0_9 = arith.constant 0 : index
    %c0_10 = arith.constant 0 : index
    %5 = vector.load %arg5[%c0_7, %c0_8, %c0_9, %c0_10] : memref<1x16x16x16xf32, #tpu.memory_space<vmem>>, vector<1x16x16x16xf32>
    %6 = vector.shape_cast %5 : vector<1x16x16x16xf32> to vector<16x16x16xf32>
    %7 = vector.shape_cast %4 : vector<16x16x16xf32> to vector<1x16x16x16xf32>
    tpu.vector_store %arg5[%c0_7, %c0_8, %c0_9, %c0_10], %7 {strides = array<i32>} : memref<1x16x16x16xf32, #tpu.memory_space<vmem>>, vector<1x16x16x16xf32>,
    return
  }
  func.func @transform_0(%arg0: i32, %arg1: i32, %arg2: i32) -> (i32, i32, i32, i32) {
    %c0_i32 = arith.constant 0 : i32
    %c0_i32_0 = arith.constant 0 : i32
    return %arg0, %arg1, %arg2, %c0_i32 : i32, i32, i32, i32
  }
  func.func @transform_1(%arg0: i32, %arg1: i32, %arg2: i32) -> (i32, i32, i32, i32) {
    %c0_i32 = arith.constant 0 : i32
    %c0_i32_0 = arith.constant 0 : i32
    %c0_i32_1 = arith.constant 0 : i32
    return %arg0, %arg1, %c0_i32, %c0_i32_0 : i32, i32, i32, i32
  }
  func.func @transform_2(%arg0: i32, %arg1: i32, %arg2: i32) -> (i32, i32, i32, i32) {
    %c0_i32 = arith.constant 0 : i32
    %c0_i32_0 = arith.constant 0 : i32
    return %arg0, %arg1, %arg2, %c0_i32 : i32, i32, i32, i32
  }
}

module attributes {stable_mosaic.version = 11 : i64} {
  func.func @_skip_kernel(%arg0: i32, %arg1: i32, %arg2: memref<1x4x128xf32, #tpu.memory_space<vmem>>, %arg3: memref<1x32x128xf32, #tpu.memory_space<vmem>>, %arg4: memref<32x4xf32, #tpu.memory_space<vmem>>, %arg5: memref<32x32xf32, #tpu.memory_space<vmem>>, %arg6: memref<32x1xf32, #tpu.memory_space<vmem>>, %arg7: memref<1x1x128xf32, #tpu.memory_space<vmem>>, %arg8: memref<1x32x128xf32, #tpu.memory_space<vmem>>) attributes {dimension_semantics = [#tpu.dimension_semantics<parallel>, #tpu.dimension_semantics<parallel>], iteration_bounds = array<i64: 2, 2>, scalar_prefetch = 0 : i64, scratch_operands = 0 : i64, tpu.core_type = #tpu.core_type<tc>, window_params = [{transform_indices = @transform_0, window_bounds = array<i64: 1, 4, 128>}, {transform_indices = @transform_1, window_bounds = array<i64: 1, 32, 128>}, {pipeline_mode = #tpu.pipeline_mode<synchronous>, transform_indices = @transform_2, window_bounds = array<i64: 32, 4>}, {pipeline_mode = #tpu.pipeline_mode<synchronous>, transform_indices = @transform_3, window_bounds = array<i64: 32, 32>}, {pipeline_mode = #tpu.pipeline_mode<synchronous>, transform_indices = @transform_4, window_bounds = array<i64: 32, 1>}, {transform_indices = @transform_5, window_bounds = array<i64: 1, 1, 128>}, {transform_indices = @transform_6, window_bounds = array<i64: 1, 32, 128>}]} {
    %c0 = arith.constant 0 : index
    %c0_0 = arith.constant 0 : index
    %0 = vector.load %arg4[%c0, %c0_0] : memref<32x4xf32, #tpu.memory_space<vmem>>, vector<32x4xf32>
    %c0_1 = arith.constant 0 : index
    %c0_2 = arith.constant 0 : index
    %c0_3 = arith.constant 0 : index
    %1 = vector.load %arg2[%c0_1, %c0_2, %c0_3] : memref<1x4x128xf32, #tpu.memory_space<vmem>>, vector<1x4x128xf32>
    %2 = vector.shape_cast %1 : vector<1x4x128xf32> to vector<4x128xf32>
    %cst = arith.constant dense<0.000000e+00> : vector<32x128xf32>
    %3 = tpu.matmul %0, %2, %cst {dimension_numbers = #tpu.dot_dimension_numbers<[1], [0], [0], [1], [0, 0, 1, 1], [], []>} : vector<32x4xf32>, vector<4x128xf32>, vector<32x128xf32> -> vector<32x128xf32>
    %c0_4 = arith.constant 0 : index
    %c0_5 = arith.constant 0 : index
    %4 = vector.load %arg5[%c0_4, %c0_5] : memref<32x32xf32, #tpu.memory_space<vmem>>, vector<32x32xf32>
    %c0_6 = arith.constant 0 : index
    %c0_7 = arith.constant 0 : index
    %c0_8 = arith.constant 0 : index
    %5 = vector.load %arg3[%c0_6, %c0_7, %c0_8] : memref<1x32x128xf32, #tpu.memory_space<vmem>>, vector<1x32x128xf32>
    %6 = vector.shape_cast %5 : vector<1x32x128xf32> to vector<32x128xf32>
    %cst_9 = arith.constant dense<0.000000e+00> : vector<32x128xf32>
    %7 = tpu.matmul %4, %6, %cst_9 {dimension_numbers = #tpu.dot_dimension_numbers<[1], [0], [0], [1], [0, 0, 1, 1], [], []>} : vector<32x32xf32>, vector<32x128xf32>, vector<32x128xf32> -> vector<32x128xf32>
    %8 = arith.addf %3, %7 : vector<32x128xf32>
    %c0_10 = arith.constant 0 : index
    %c0_11 = arith.constant 0 : index
    %9 = vector.load %arg6[%c0_10, %c0_11] : memref<32x1xf32, #tpu.memory_space<vmem>>, vector<32x1xf32>
    %10 = vector.broadcast %9 : vector<32x1xf32> to vector<32x128xf32>
    %11 = arith.addf %8, %10 : vector<32x128xf32>
    %c0_12 = arith.constant 0 : index
    %c0_13 = arith.constant 0 : index
    %c0_14 = arith.constant 0 : index
    %12 = vector.load %arg7[%c0_12, %c0_13, %c0_14] : memref<1x1x128xf32, #tpu.memory_space<vmem>>, vector<1x1x128xf32>
    %13 = vector.shape_cast %12 : vector<1x1x128xf32> to vector<1x128xf32>
    %14 = vector.broadcast %13 : vector<1x128xf32> to vector<32x128xf32>
    %15 = arith.mulf %11, %14 : vector<32x128xf32>
    %c0_15 = arith.constant 0 : index
    %c0_16 = arith.constant 0 : index
    %c0_17 = arith.constant 0 : index
    %16 = vector.load %arg8[%c0_15, %c0_16, %c0_17] : memref<1x32x128xf32, #tpu.memory_space<vmem>>, vector<1x32x128xf32>
    %17 = vector.shape_cast %16 : vector<1x32x128xf32> to vector<32x128xf32>
    %18 = vector.shape_cast %15 : vector<32x128xf32> to vector<1x32x128xf32>
    tpu.vector_store %arg8[%c0_15, %c0_16, %c0_17], %18 {strides = array<i32>} : memref<1x32x128xf32, #tpu.memory_space<vmem>>, vector<1x32x128xf32>,
    return
  }
  func.func @transform_0(%arg0: i32, %arg1: i32) -> (i32, i32, i32) {
    %c0_i32 = arith.constant 0 : i32
    %c0_i32_0 = arith.constant 0 : i32
    return %arg0, %c0_i32, %arg1 : i32, i32, i32
  }
  func.func @transform_1(%arg0: i32, %arg1: i32) -> (i32, i32, i32) {
    %c0_i32 = arith.constant 0 : i32
    %c0_i32_0 = arith.constant 0 : i32
    return %arg0, %c0_i32, %arg1 : i32, i32, i32
  }
  func.func @transform_2(%arg0: i32, %arg1: i32) -> (i32, i32) {
    %c0_i32 = arith.constant 0 : i32
    %c0_i32_0 = arith.constant 0 : i32
    %c0_i32_1 = arith.constant 0 : i32
    return %c0_i32, %c0_i32_0 : i32, i32
  }
  func.func @transform_3(%arg0: i32, %arg1: i32) -> (i32, i32) {
    %c0_i32 = arith.constant 0 : i32
    %c0_i32_0 = arith.constant 0 : i32
    %c0_i32_1 = arith.constant 0 : i32
    return %c0_i32, %c0_i32_0 : i32, i32
  }
  func.func @transform_4(%arg0: i32, %arg1: i32) -> (i32, i32) {
    %c0_i32 = arith.constant 0 : i32
    %c0_i32_0 = arith.constant 0 : i32
    %c0_i32_1 = arith.constant 0 : i32
    return %c0_i32, %c0_i32_0 : i32, i32
  }
  func.func @transform_5(%arg0: i32, %arg1: i32) -> (i32, i32, i32) {
    %c0_i32 = arith.constant 0 : i32
    %c0_i32_0 = arith.constant 0 : i32
    return %arg0, %c0_i32, %arg1 : i32, i32, i32
  }
  func.func @transform_6(%arg0: i32, %arg1: i32) -> (i32, i32, i32) {
    %c0_i32 = arith.constant 0 : i32
    %c0_i32_0 = arith.constant 0 : i32
    return %arg0, %c0_i32, %arg1 : i32, i32, i32
  }
}

</mosaic_0001>

<bundles_post_ra>
// kernel: regular_block_forward.4
= control target key start
LH: loop header
LB: loop body
LE: loop exit
PB: predicated region body
PF: predicated region fallthrough
CT: control target
= control target key end

     0   :  { %s2783_s0 = inlined_call_operand.hbm [shape: f32[2,32,16,16], index: 0, kind: input, shape index: {}]   ;;  %s2784_s1 = inlined_call_operand.hbm [shape: f32[2,32,16,16], index: 1, kind: input, shape index: {}]   ;;  %s2785_s2 = inlined_call_operand.hbm [shape: f32[2,32,16,16], index: 2, kind: output, shape index: {}]  }
   0x1   :  { %2790 = sst [smem:[#allocation12_spill]] %s2783_s0 }
   0x2   :  { %7 = vsyncpa [#allocation3], 0 }
   0x3   :  { %9 = vsyncpa [#allocation3 + $0x1], 0 }
   0x4   :  { %10 = vsyncpa [#allocation6], 0 }
   0x5   :  { %12 = vsyncpa [#allocation6 + $0x1], 0 }
   0x6   :  { %13 = vsyncpa [#allocation4], 0 }
   0x7   :  { %15 = vsyncpa [#allocation4 + $0x1], 0  ;;  %s2352_s9 = smov 0   ;;  %s2354_s10 = smov 0  }
   0x8   :  { %s2356_s11 = smov 0   ;;  %s2358_s12 = smov 0  }
   0x9   :  { %s2360_s13 = smov 0   ;;  %s2362_s14 = smov 0  }
   0xa   :  { %s2364_s15 = smov 0   ;;  %s2366_s16 = smov 0  }
   0xb LB: > { %s1779_s17 = sadd.s32 4294967295, %s2328_s16   ;;  %s1780_s18 = sadd.s32 4294967294, %s2328_s16   ;;  %s2328_s16 = sphi %s2366_s16, %s21_s16   ;;  %s2324_s15 = sphi %s2364_s15, %s2810_s15   ;;  %s2320_s14 = sphi %s2362_s14, %s2809_s14   ;;  %s2316_s13 = sphi %s2360_s13, %s2808_s13   ;;  %s2312_s12 = sphi %s2358_s12, %s2807_s12   ;;  %s2308_s11 = sphi %s2356_s11, %s2806_s11   ;;  %s2304_s10 = sphi %s2354_s10, %s2805_s10   ;;  %s2300_s9 = sphi %s2352_s9, %s2804_s9  }
   0xc   : > { %s36_s19 = sadd.s32 1, %s2320_s14  ;;  %s40_s20 = sadd.s32 1, %s2324_s15 }
   0xd   : > { %p38_p0 = scmp.ge.s32.totalorder %s36_s19, 2  ;;  %s51_s21 = sadd.s32 1, %s2308_s11 }
   0xe   : > { %p58_p1 = scmp.ne.s32.totalorder %s2308_s11, %s2304_s10  ;;  %p59_p2 = scmp.eq.s32.totalorder %s2328_s16, 0 }
   0xf   : > { %s2812_s19 = smov (%p38_p0, %s36_s19), 0  ;;  %s2814_s20 = smov (!%p38_p0, %s40_s20), %s2324_s15 }
  0x10   : > { %s45_s22 = ssub.s32 %s2320_s14, %s2812_s19  ;;  %p2405_p3 = por %p59_p2, %p58_p1 }
  0x11   : > { %p42_p4 = scmp.ge.s32.totalorder %s2814_s20, 2  ;;  %p64_p5 = scmp.ne.s32.totalorder %s2304_s10, %s2300_s9 }
  0x12   : > { %p65_p6 = scmp.eq.s32.totalorder %s1779_s17, 0  ;;  %p120_p7 = scmp.eq.s32.totalorder %s1779_s17, 3 }
  0x13   : > { %s2816_s20 = smov (%p42_p4, %s2814_s20), 0  ;;  %p126_p10 = scmp.eq.s32.totalorder %s1780_s18, 3 }
  0x14   : > { %2792 = sst [smem:[#allocation11_spill]] %s2816_s20  ;;  %p2413_p8 = por %p65_p6, %p64_p5 }
  0x15   : > { %p2417_p9 = por %p120_p7, %p58_p1  ;;  %s44_s26 = ssub.s32 %s2324_s15, %s2816_s20 }
  0x16   : > { %s2793_s24 = scalar_select %p2413_p8, 1, 0 }
  0x17   : > { %s2794_s25 = scalar_select %p2417_p9, 1, 0 }
  0x18   : > { %s46_s27 = sor.u32 %s45_s22, %s44_s26  ;;  %p2423_p12 = por %p126_p10, %p64_p5 }
  0x19   : > { %p49_p11 = scmp.eq.s32.totalorder %s46_s27, 0  ;;  %p2096_p13 = scmp.lt.s32.totalorder %s2328_s16, 4 }
  0x1a   : > { %s2795_s28 = scalar_select %p2423_p12, 1, 0 }
  0x1b   : > { %s2429_s29 = sand.u32 1, %s2308_s11   ;;  %s1836_s4 = sshll.u32 %s2320_s14, 5 }
  0x1c   : > { %s2432_s30 = scalar_select %p49_p11, %s2308_s11, %s51_s21  }
  0x1d   : > { %s2786_s3 = sshll.u32 %s2429_s29, 8  ;;  %s1786_s5 = sshll.u32 %s2324_s15, 6 }
  0x1e   : > { %s150_s6 = scalar_lea.vmem [#allocation2], %s2786_s3  ;;  %s2439_s8 = sadd.s32 %s1836_s4, %s1786_s5 }
  0x1f   : > { %s162_s7 = sshll.u32 %s150_s6, 4  ;;  %s1787_s17 = sshll.u32 %s2439_s8, 7  ;;  %s2441_s7 = int_to_ptr.vmem [resolvable:$true] %s162_s7 }
  0x20   : > { %p2446_p0 = pnand %p2096_p13, %p2405_p3  ;;  %s2797_s0 = sld [smem:[#allocation12_spill]] }
  0x21   : > { %s147_s27 = scalar_lea.sflag [#allocation3], %s2429_s29 }
  0x22   : > { %p2168_p2 = pneg %p2446_p0 }
  0x26   : > { %s2455_s26 = scalar_lea.hbm %s2797_s0, %s1787_s17  ;;  %s2171_s6 = scalar_lea.hbm %s2797_s0, 16384 }
  0x27   : > { %s2166_s4 = scalar_lea.hbm %s2455_s26, 4096  ;;  %p2172_p5 = scmp.lt.u32.totalorder %s2455_s26, %s2797_s0 }
  0x28   : > { %p2167_p1 = scmp.ne.s32.totalorder %s2455_s26, %s2166_s4  ;;  %p2173_p6 = scmp.lt.u32.totalorder %s2171_s6, %s2166_s4 }
  0x29   : > { %p2175_p10 = scmp.lt.u32.totalorder %s2166_s4, %s2455_s26 }
  0x2a   : > { %p2169_p3 = pnand %p2168_p2, %p2167_p1  ;;  %p2174_p7 = por %p2173_p6, %p2172_p5 }
  0x2c   : > { %p2170_p4 = pneg %p2169_p3  ;;  %p2176_p11 = por %p2175_p10, %p2174_p7 }
  0x2e   : > { %p2177_p13 = pnand %p2176_p11, %p2170_p4 }
  0x30   : > { %2180 = shalt.err (!%p2177_p13)
}
  0x31   : > { %s2181_s3 = scalar_lea.vmem %s2441_s7, 4096  ;;  %s2330_s23 = smov [#allocation2]  }
  0x32   : > { %p2182_p1 = scmp.ne.s32.totalorder %s2441_s7, %s2181_s3  ;;  %s2186_s5 = sshll.u32 %s2330_s23, 4  ;;  %s2187_s5 = int_to_ptr.vmem [resolvable:$false] %s2186_s5 }
  0x33   : > { %s2188_s21 = scalar_lea.vmem %s2187_s5, 8192  ;;  %p2189_p9 = scmp.lt.s32.totalorder %s2441_s7, %s2187_s5 }
  0x34   : > { %p2184_p3 = pnand %p2182_p1, %p2168_p2  ;;  %p2190_p5 = scmp.lt.s32.totalorder %s2188_s21, %s2181_s3 }
  0x36   : > { %p2185_p12 = pneg %p2184_p3  ;;  %p2191_p6 = por %p2190_p5, %p2189_p9 }
  0x38   : > { %p2192_p7 = pnand %p2191_p6, %p2185_p12 }
  0x3a   : > { %2195 = shalt.err (!%p2192_p7)
}
  0x3b   : > { %s2331_s4 = smov 128   ;;  %s2332_s6 = smov 8  }
  0x3c   : > { %2088 = dma.hbm_to_vmem [thread:$0]  (!%p2446_p0), %s2455_s26, 4096, %s2441_s7, %s147_s27, %s2331_s4, %s2331_s4, %s2332_s6  }
  0x3d   : > { %p1793_p9 = scmp.ge.s32.totalorder %s2328_s16, 1  ;;  %p194_p12 = scmp.lt.s32.totalorder %s2328_s16, 5 }
  0x3e   : > { %s2499_s5 = scalar_lea.hbm %s2784_s1, %s1787_s17  ;;  %s2799_s21 = sshll.u32 %s2429_s29, 8 }
  0x3f   : > { %p2490_p4 = pnand %p1793_p9, %p194_p12  ;;  %s176_s0 = scalar_lea.vmem [#allocation5], %s2799_s21 }
  0x40   : > { %s186_s20 = sshll.u32 %s176_s0, 4  ;;  %s173_s7 = scalar_lea.sflag [#allocation6], %s2429_s29  ;;  %s2503_s20 = int_to_ptr.vmem [resolvable:$true] %s186_s20 }
  0x41   : > { %s2196_s26 = scalar_lea.hbm %s2499_s5, 4096  ;;  %s2201_s17 = scalar_lea.hbm %s2784_s1, 16384 }
  0x42   : > { %p2197_p10 = scmp.ne.s32.totalorder %s2499_s5, %s2196_s26  ;;  %p2202_p1 = scmp.lt.u32.totalorder %s2499_s5, %s2784_s1 }
  0x43   : > { %p2203_p3 = scmp.lt.u32.totalorder %s2201_s17, %s2196_s26  ;;  %p2205_p6 = scmp.lt.u32.totalorder %s2196_s26, %s2499_s5 }
  0x44   : > { %p2199_p11 = pnand %p2197_p10, %p2168_p2 }
  0x45   : > { %p2204_p5 = por %p2203_p3, %p2202_p1 }
  0x46   : > { %p2200_p13 = pneg %p2199_p11 }
  0x47   : > { %p2206_p7 = por %p2205_p6, %p2204_p5 }
  0x49   : > { %p2207_p9 = pnand %p2206_p7, %p2200_p13 }
  0x4b   : > { %2210 = shalt.err (!%p2207_p9)
}
  0x4c   : > { %s2211_s0 = scalar_lea.vmem %s2503_s20, 4096  ;;  %s2333_s21 = smov [#allocation5]  }
  0x4d   : > { %p2212_p12 = scmp.ne.s32.totalorder %s2503_s20, %s2211_s0  ;;  %s2216_s8 = sshll.u32 %s2333_s21, 4  ;;  %s2217_s8 = int_to_ptr.vmem [resolvable:$false] %s2216_s8 }
  0x4e   : > { %s2218_s27 = scalar_lea.vmem %s2217_s8, 8192  ;;  %p2219_p8 = scmp.lt.s32.totalorder %s2503_s20, %s2217_s8 }
  0x4f   : > { %p2214_p10 = pnand %p2212_p12, %p2168_p2  ;;  %p2220_p1 = scmp.lt.s32.totalorder %s2218_s27, %s2211_s0 }
  0x51   : > { %p2215_p11 = pneg %p2214_p10  ;;  %p2221_p3 = por %p2220_p1, %p2219_p8 }
  0x53   : > { %p2222_p5 = pnand %p2221_p3, %p2215_p11 }
  0x55   : > { %2225 = shalt.err (!%p2222_p5)
}
  0x56   : > { %2091 = dma.hbm_to_vmem [thread:$0]  (!%p2446_p0), %s2499_s5, 4096, %s2503_s20, %s173_s7, %s2331_s4, %s2331_s4, %s2332_s6  }
  0x57   : > { %198 = sbr.rel (%p2490_p4) target bundleno = 361 (0x169), region = 28  ;;  %s2537_s26 = sand.u32 (!%p2490_p4), 1, %s2304_s10  }
  0x58   : > { %s2540_s17 = sshll.u32 (!%p2490_p4), %s2537_s26, 8  ;;  %s201_s18 = scalar_lea.sflag (!%p2490_p4), [#allocation3], %s2537_s26 }
  0x59   : > { %s2544_s22 = scalar_lea.vmem (!%p2490_p4), [#allocation2], %s2540_s17  ;;  %p2800_p8 = scmp.ne.s32.totalorder (!%p2490_p4), %s2793_s24, 0 }
  0x5e   : > { %2287 = dma.done.wait (%p2800_p8), %s201_s18, 4096  }
  0x5f   : > { %2289 = vsyncadd (%p2800_p8), %s201_s18, 4294963200  ;;  %s210_s20 = scalar_lea.sflag [#allocation6], %s2537_s26  ;;  %s2552_s29 = scalar_lea.vmem [#allocation5], %s2540_s17 }
  0x60   : > { %2291 = dma.done.wait (%p2800_p8), %s210_s20, 4096  }
  0x61   : > { %2293 = vsyncadd (%p2800_p8), %s210_s20, 4294963200  ;;  %vm308_vm0 = vcmask 130048   ;;  %v276_v0 = vld [vmem:[%s2552_s29] sm:$0xff]  ;;  %v277_v1 = vld [vmem:[%s2552_s29 + $0x8] sm:$0xff]  ;;  %s2655_s24 = scalar_lea.vmem [#allocation7], %s2540_s17  ;;  %s1838_s4 = sshll.u32 %s2312_s12, 5 }
  0x62   : > { %v278_v2 = vld [vmem:[%s2552_s29 + $0x10] sm:$0xff]  ;;  %v2015_v3 = vpack.c.bf16 %v277_v1, %v276_v0  ;;  %v279_v4 = vld [vmem:[%s2552_s29 + $0x18] sm:$0xff]  ;;  %v244_v5 = vld [vmem:[%s2544_s22] sm:$0xff]  ;;  %s1832_s6 = sshll.u32 %s2316_s13, 6  ;;  %s1656_s13 = sshll.u32 %s2655_s24, 4  ;;  %s2721_s13 = int_to_ptr.vmem [resolvable:$true] %s1656_s13 }
  0x63   : > { %v246_v6 = vld [vmem:[%s2544_s22 + $0x10] sm:$0xff]  ;;  %v2019_v7 = vpack.c.bf16 %v279_v4, %v278_v2  ;;  %1907 = vmatprep.mubr.msk.f32.mxu0 %vm308_vm0, %v244_v5  ;;  %v280_v8 = vld [vmem:[%s2552_s29 + $0x20] sm:$0xff]  ;;  %v281_v9 = vld [vmem:[%s2552_s29 + $0x28] sm:$0xff]  ;;  %s1653_s3 = sadd.s32 %s1838_s4, %s1832_s6  ;;  %s1638_s0 = scalar_lea.sflag [#allocation4], %s2537_s26 }
  0x64   : > { %1914 = vmatprep.mubr.msk.f32.mxu1 %vm308_vm0, %v246_v6  ;;  %2016 = vmatprep.subr.bf16.mxu0 %v2015_v3  ;;  %v282_v10 = vld [vmem:[%s2552_s29 + $0x30] sm:$0xff]  ;;  %v283_v11 = vld [vmem:[%s2552_s29 + $0x38] sm:$0xff]  ;;  %v245_v12 = vld [vmem:[%s2544_s22 + $0x8] sm:$0xff]  ;;  %v2023_v13 = vpack.c.bf16 %v281_v9, %v280_v8  ;;  %s1833_s12 = sshll.u32 %s1653_s3, 7  ;;  %s2226_s21 = scalar_lea.vmem %s2721_s13, 4096 }
  0x65   : > { %2020 = vmatprep.subr.bf16.mxu1 %v2019_v7  ;;  %2018 = vmatpush3.bf16.msra.mxu0 %v2015_v3  ;;  %v2027_v14 = vpack.c.bf16 %v283_v11, %v282_v10  ;;  %v247_v15 = vld [vmem:[%s2544_s22 + $0x18] sm:$0xff]  ;;  %v284_v16 = vld [vmem:[%s2552_s29 + $0x40] sm:$0xff]  ;;  %v285_v17 = vld [vmem:[%s2552_s29 + $0x48] sm:$0xff]  ;;  %s2719_s23 = scalar_lea.hbm %s2785_s2, %s1833_s12  ;;  %p2227_p0 = scmp.ne.s32.totalorder %s2721_s13, %s2226_s21 }
  0x66   : > { %2022 = vmatpush3.bf16.msra.mxu1 %v2019_v7  ;;  %2024 = vmatprep.subr.bf16.mxu0 %v2023_v13  ;;  %v248_v18 = vld [vmem:[%s2544_s22 + $0x20] sm:$0xff]  ;;  %v2031_v19 = vpack.c.bf16 %v285_v17, %v284_v16  ;;  %v286_v20 = vld [vmem:[%s2552_s29 + $0x50] sm:$0xff]  ;;  %v287_v21 = vld [vmem:[%s2552_s29 + $0x58] sm:$0xff]  ;;  %p2801_p2 = scmp.ne.s32.totalorder %s2794_s25, 0  ;;  %s2334_s8 = smov [#allocation7]  }
  0x67   : > { %2028 = vmatprep.subr.bf16.mxu1 %v2027_v14  ;;  %v250_v22 = vld [vmem:[%s2544_s22 + $0x30] sm:$0xff]  ;;  %v249_v23 = vld [vmem:[%s2544_s22 + $0x28] sm:$0xff]  ;;  %v2035_v24 = vpack.c.bf16 %v287_v21, %v286_v20  ;;  %v288_v25 = vld [vmem:[%s2552_s29 + $0x60] sm:$0xff]  ;;  %s2230_s27 = sshll.u32 %s2334_s8, 4  ;;  %s2231_s27 = int_to_ptr.vmem [resolvable:$false] %s2230_s27 }
  0x68   : > { %1908 = vmatmul.mubr.msk.f32.vlgmr.msra.gmra.mrb[0].mxu0 %vm308_vm0, %v245_v12  ;;  %v289_v26 = vld [vmem:[%s2552_s29 + $0x68] sm:$0xff]  ;;  %v290_v27 = vld [vmem:[%s2552_s29 + $0x70] sm:$0xff]  ;;  %v251_v28 = vld [vmem:[%s2544_s22 + $0x38] sm:$0xff]  ;;  %p2228_p4 = pnand %p2227_p0, %p2801_p2  ;;  %s2232_s17 = scalar_lea.vmem %s2231_s27, 8192 }
  0x69   : > { %1915 = vmatmul.mubr.msk.f32.vlgmr.msra.gmra.mrb[0].mxu1 %vm308_vm0, %v247_v15  ;;  %2026 = vmatpush3.bf16.msra.mxu0 %v2023_v13  ;;  %v291_v29 = vld [vmem:[%s2552_s29 + $0x78] sm:$0xff]  ;;  %v252_v30 = vld [vmem:[%s2544_s22 + $0x40] sm:$0xff]  ;;  %v2039_v31 = vpack.c.bf16 %v289_v26, %v288_v25  ;;  %v254_v32 = vld [vmem:[%s2544_s22 + $0x50] sm:$0xff]  ;;  %p2233_p6 = scmp.lt.s32.totalorder %s2721_s13, %s2231_s27  ;;  %p2234_p7 = scmp.lt.s32.totalorder %s2232_s17, %s2226_s21 }
  0x6a   : > { %2030 = vmatpush3.bf16.msra.mxu1 %v2027_v14  ;;  %1921 = vmatprep.mubr.msk.f32.mxu0 %vm308_vm0, %v248_v18  ;;  %v2043_v33 = vpack.c.bf16 %v291_v29, %v290_v27  ;;  %v292_v34 = vld [vmem:[%s2552_s29 + $0x80] sm:$0xff]  ;;  %v293_v35 = vld [vmem:[%s2552_s29 + $0x88] sm:$0xff]  ;;  %v294_v37 = vld [vmem:[%s2552_s29 + $0x90] sm:$0xff]  ;;  %p2229_p13 = pneg %p2228_p4 }
  0x6b   : > { %1928 = vmatprep.mubr.msk.f32.mxu1 %vm308_vm0, %v250_v22  ;;  %2032 = vmatprep.subr.bf16.mxu0 %v2031_v19  ;;  %v253_v36 = vld [vmem:[%s2544_s22 + $0x48] sm:$0xff]  ;;  %v295_v38 = vld [vmem:[%s2552_s29 + $0x98] sm:$0xff]  ;;  %v256_v40 = vld [vmem:[%s2544_s22 + $0x60] sm:$0xff]  ;;  %v2047_v41 = vpack.c.bf16 %v293_v35, %v292_v34  ;;  %p2235_p9 = por %p2234_p7, %p2233_p6 }
  0x6c   : > { %1922 = vmatmul.mubr.msk.f32.vlgmr.msra.gmra.mrb[2].mxu0 %vm308_vm0, %v249_v23  ;;  %2036 = vmatprep.subr.bf16.mxu1 %v2035_v24  ;;  %v255_v39 = vld [vmem:[%s2544_s22 + $0x58] sm:$0xff]  ;;  %v258_v42 = vld [vmem:[%s2544_s22 + $0x70] sm:$0xff]  ;;  %v2051_v43 = vpack.c.bf16 %v295_v38, %v294_v37  ;;  %v296_v44 = vld [vmem:[%s2552_s29 + $0xa0] sm:$0xff] }
  0x6d   : > { %1929 = vmatmul.mubr.msk.f32.vlgmr.msra.gmra.mrb[2].mxu1 %vm308_vm0, %v251_v28  ;;  %2034 = vmatpush3.bf16.msra.mxu0 %v2031_v19  ;;  %v297_v45 = vld [vmem:[%s2552_s29 + $0xa8] sm:$0xff]  ;;  %v298_v47 = vld [vmem:[%s2552_s29 + $0xb0] sm:$0xff]  ;;  %v299_v48 = vld [vmem:[%s2552_s29 + $0xb8] sm:$0xff]  ;;  %p2236_p12 = pnand %p2235_p9, %p2229_p13 }
  0x6e   : > { %2038 = vmatpush3.bf16.msra.mxu1 %v2035_v24  ;;  %1935 = vmatprep.mubr.msk.f32.mxu0 %vm308_vm0, %v252_v30  ;;  %v257_v46 = vld [vmem:[%s2544_s22 + $0x68] sm:$0xff]  ;;  %v259_v49 = vld [vmem:[%s2544_s22 + $0x78] sm:$0xff]  ;;  %v260_v50 = vld [vmem:[%s2544_s22 + $0x80] sm:$0xff]  ;;  %v2055_v51 = vpack.c.bf16 %v297_v45, %v296_v44  ;;  %v2059_v53 = vpack.c.bf16 %v299_v48, %v298_v47 }
  0x6f   : > { %1942 = vmatprep.mubr.msk.f32.mxu1 %vm308_vm0, %v254_v32  ;;  %2040 = vmatprep.subr.bf16.mxu0 %v2039_v31  ;;  %v262_v52 = vld [vmem:[%s2544_s22 + $0x90] sm:$0xff]  ;;  %v300_v54 = vld [vmem:[%s2552_s29 + $0xc0] sm:$0xff]  ;;  %v301_v55 = vld [vmem:[%s2552_s29 + $0xc8] sm:$0xff] }
  0x70   : > { %1936 = vmatmul.mubr.msk.f32.vlgmr.msra.gmra.mrb[4].mxu0 %vm308_vm0, %v253_v36  ;;  %2044 = vmatprep.subr.bf16.mxu1 %v2043_v33  ;;  %v261_v56 = vld [vmem:[%s2544_s22 + $0x88] sm:$0xff]  ;;  %v302_v57 = vld [vmem:[%s2552_s29 + $0xd0] sm:$0xff]  ;;  %v303_v58 = vld [vmem:[%s2552_s29 + $0xd8] sm:$0xff]  ;;  %v2063_v61 = vpack.c.bf16 %v301_v55, %v300_v54 }
  0x71   : > { %1943 = vmatmul.mubr.msk.f32.vlgmr.msra.gmra.mrb[4].mxu1 %vm308_vm0, %v255_v39  ;;  %2042 = vmatpush3.bf16.msra.mxu0 %v2039_v31  ;;  %v263_v59 = vld [vmem:[%s2544_s22 + $0x98] sm:$0xff]  ;;  %v264_v60 = vld [vmem:[%s2544_s22 + $0xa0] sm:$0xff]  ;;  %v266_v62 = vld [vmem:[%s2544_s22 + $0xb0] sm:$0xff]  ;;  %v2067_v63 = vpack.c.bf16 %v303_v58, %v302_v57 }
  0x72   : > { %2046 = vmatpush3.bf16.msra.mxu1 %v2043_v33  ;;  %1949 = vmatprep.mubr.msk.f32.mxu0 %vm308_vm0, %v256_v40  ;;  %v304_v0 = vld [vmem:[%s2552_s29 + $0xe0] sm:$0xff]  ;;  %v305_v1 = vld [vmem:[%s2552_s29 + $0xe8] sm:$0xff]  ;;  %v306_v3 = vld [vmem:[%s2552_s29 + $0xf0] sm:$0xff] }
  0x73   : > { %1956 = vmatprep.mubr.msk.f32.mxu1 %vm308_vm0, %v258_v42  ;;  %2048 = vmatprep.subr.bf16.mxu0 %v2047_v41  ;;  %v265_v2 = vld [vmem:[%s2544_s22 + $0xa8] sm:$0xff]  ;;  %v307_v4 = vld [vmem:[%s2552_s29 + $0xf8] sm:$0xff]  ;;  %v268_v6 = vld [vmem:[%s2544_s22 + $0xc0] sm:$0xff]  ;;  %v2071_v7 = vpack.c.bf16 %v305_v1, %v304_v0 }
  0x74   : > { %1950 = vmatmul.mubr.msk.f32.vlgmr.msra.gmra.mrb[6].mxu0 %vm308_vm0, %v257_v46  ;;  %2052 = vmatprep.subr.bf16.mxu1 %v2051_v43  ;;  %v267_v5 = vld [vmem:[%s2544_s22 + $0xb8] sm:$0xff]  ;;  %v270_v8 = vld [vmem:[%s2544_s22 + $0xd0] sm:$0xff]  ;;  %v2075_v9 = vpack.c.bf16 %v307_v4, %v306_v3  ;;  %v269_v10 = vld [vmem:[%s2544_s22 + $0xc8] sm:$0xff] }
  0x75   : > { %1957 = vmatmul.mubr.msk.f32.vlgmr.msra.gmra.mrb[6].mxu1 %vm308_vm0, %v259_v49  ;;  %2050 = vmatpush3.bf16.msra.mxu0 %v2047_v41  ;;  %v271_v11 = vld [vmem:[%s2544_s22 + $0xd8] sm:$0xff]  ;;  %v272_v12 = vld [vmem:[%s2544_s22 + $0xe0] sm:$0xff]  ;;  %v274_v13 = vld [vmem:[%s2544_s22 + $0xf0] sm:$0xff] }
  0x76   : > { %2054 = vmatpush3.bf16.msra.mxu1 %v2051_v43  ;;  %1963 = vmatprep.mubr.msk.f32.mxu0 %vm308_vm0, %v260_v50  ;;  %v273_v14 = vld [vmem:[%s2544_s22 + $0xe8] sm:$0xff]  ;;  %v275_v15 = vld [vmem:[%s2544_s22 + $0xf8] sm:$0xff] }
  0x77   : > { %1970 = vmatprep.mubr.msk.f32.mxu1 %vm308_vm0, %v262_v52  ;;  %2056 = vmatprep.subr.bf16.mxu0 %v2055_v51 }
  0x78   : > { %1964 = vmatmul.mubr.msk.f32.vlgmr.msra.gmra.mrb[8].mxu0 %vm308_vm0, %v261_v56  ;;  %2060 = vmatprep.subr.bf16.mxu1 %v2059_v53 }
  0x79   : > { %1971 = vmatmul.mubr.msk.f32.vlgmr.msra.gmra.mrb[8].mxu1 %vm308_vm0, %v263_v59  ;;  %2058 = vmatpush3.bf16.msra.mxu0 %v2055_v51 }
  0x7a   : > { %2062 = vmatpush3.bf16.msra.mxu1 %v2059_v53  ;;  %1977 = vmatprep.mubr.msk.f32.mxu0 %vm308_vm0, %v264_v60 }
  0x7b   : > { %1984 = vmatprep.mubr.msk.f32.mxu1 %vm308_vm0, %v266_v62  ;;  %2064 = vmatprep.subr.bf16.mxu0 %v2063_v61 }
  0x7c   : > { %1978 = vmatmul.mubr.msk.f32.vlgmr.msra.gmra.mrb[10].mxu0 %vm308_vm0, %v265_v2  ;;  %2068 = vmatprep.subr.bf16.mxu1 %v2067_v63 }
  0x7d   : > { %1985 = vmatmul.mubr.msk.f32.vlgmr.msra.gmra.mrb[10].mxu1 %vm308_vm0, %v267_v5  ;;  %2066 = vmatpush3.bf16.msra.mxu0 %v2063_v61 }
  0x7e   : > { %2070 = vmatpush3.bf16.msra.mxu1 %v2067_v63  ;;  %1991 = vmatprep.mubr.msk.f32.mxu0 %vm308_vm0, %v268_v6 }
  0x7f   : > { %1998 = vmatprep.mubr.msk.f32.mxu1 %vm308_vm0, %v270_v8  ;;  %2072 = vmatprep.subr.bf16.mxu0 %v2071_v7 }
  0x80   : > { %1992 = vmatmul.mubr.msk.f32.vlgmr.msra.gmra.mrb[12].mxu0 %vm308_vm0, %v269_v10  ;;  %2076 = vmatprep.subr.bf16.mxu1 %v2075_v9 }
  0x81   : > { %1999 = vmatmul.mubr.msk.f32.vlgmr.msra.gmra.mrb[12].mxu1 %vm308_vm0, %v271_v11  ;;  %2074 = vmatpush3.bf16.msra.mxu0 %v2071_v7 }
  0x82   : > { %2078 = vmatpush3.bf16.msra.mxu1 %v2075_v9  ;;  %2005 = vmatprep.mubr.msk.f32.mxu0 %vm308_vm0, %v272_v12 }
  0x83   : > { %2012 = vmatprep.mubr.msk.f32.mxu1 %vm308_vm0, %v274_v13 }
  0x84   : > { %2006 = vmatmul.mubr.msk.f32.vlgmr.msra.gmra.mrb[14].mxu0 %vm308_vm0, %v273_v14 }
  0x85   : > { %2013 = vmatmul.mubr.msk.f32.vlgmr.msra.gmra.mrb[14].mxu1 %vm308_vm0, %v275_v15 }
 0x13b   : > { %v1909_v16 = vpop.f32.mrb[0].mxu0 }
 0x13c   : > { %1606 = vst.msk [vmem:[%s2655_s24 + $0x8] sm:$0xff] %vm308_vm0, %v1909_v16  ;;  %v1916_v17 = vpop.f32.mrb[0].mxu1  ;;  %v381_v18 = vpop.f32.mrb[1].mxu0 }
 0x13d   : > { %1608 = vst.msk [vmem:[%s2655_s24 + $0x18] sm:$0xff] %vm308_vm0, %v1916_v17  ;;  %1605 = vst.msk [vmem:[%s2655_s24] sm:$0xff] %vm308_vm0, %v381_v18  ;;  %v462_v19 = vpop.f32.mrb[1].mxu1 }
 0x13e   : > { %1607 = vst.msk [vmem:[%s2655_s24 + $0x10] sm:$0xff] %vm308_vm0, %v462_v19 }
 0x13f   : > { %v1923_v20 = vpop.f32.mrb[2].mxu0 }
 0x140   : > { %1610 = vst.msk [vmem:[%s2655_s24 + $0x28] sm:$0xff] %vm308_vm0, %v1923_v20  ;;  %v1930_v21 = vpop.f32.mrb[2].mxu1  ;;  %v543_v22 = vpop.f32.mrb[3].mxu0 }
 0x141   : > { %1612 = vst.msk [vmem:[%s2655_s24 + $0x38] sm:$0xff] %vm308_vm0, %v1930_v21  ;;  %1609 = vst.msk [vmem:[%s2655_s24 + $0x20] sm:$0xff] %vm308_vm0, %v543_v22  ;;  %v624_v23 = vpop.f32.mrb[3].mxu1 }
 0x142   : > { %1611 = vst.msk [vmem:[%s2655_s24 + $0x30] sm:$0xff] %vm308_vm0, %v624_v23 }
 0x143   : > { %v1937_v24 = vpop.f32.mrb[4].mxu0 }
 0x144   : > { %1614 = vst.msk [vmem:[%s2655_s24 + $0x48] sm:$0xff] %vm308_vm0, %v1937_v24  ;;  %v1944_v25 = vpop.f32.mrb[4].mxu1  ;;  %v705_v26 = vpop.f32.mrb[5].mxu0 }
 0x145   : > { %1616 = vst.msk [vmem:[%s2655_s24 + $0x58] sm:$0xff] %vm308_vm0, %v1944_v25  ;;  %1613 = vst.msk [vmem:[%s2655_s24 + $0x40] sm:$0xff] %vm308_vm0, %v705_v26  ;;  %v786_v27 = vpop.f32.mrb[5].mxu1 }
 0x146   : > { %1615 = vst.msk [vmem:[%s2655_s24 + $0x50] sm:$0xff] %vm308_vm0, %v786_v27 }
 0x147   : > { %v1951_v28 = vpop.f32.mrb[6].mxu0 }
 0x148   : > { %1618 = vst.msk [vmem:[%s2655_s24 + $0x68] sm:$0xff] %vm308_vm0, %v1951_v28  ;;  %v1958_v29 = vpop.f32.mrb[6].mxu1  ;;  %v867_v30 = vpop.f32.mrb[7].mxu0 }
 0x149   : > { %1620 = vst.msk [vmem:[%s2655_s24 + $0x78] sm:$0xff] %vm308_vm0, %v1958_v29  ;;  %1617 = vst.msk [vmem:[%s2655_s24 + $0x60] sm:$0xff] %vm308_vm0, %v867_v30  ;;  %v948_v31 = vpop.f32.mrb[7].mxu1 }
 0x14a   : > { %1619 = vst.msk [vmem:[%s2655_s24 + $0x70] sm:$0xff] %vm308_vm0, %v948_v31 }
 0x14b   : > { %v1965_v32 = vpop.f32.mrb[8].mxu0 }
 0x14c   : > { %1622 = vst.msk [vmem:[%s2655_s24 + $0x88] sm:$0xff] %vm308_vm0, %v1965_v32  ;;  %v1972_v33 = vpop.f32.mrb[8].mxu1  ;;  %v1029_v34 = vpop.f32.mrb[9].mxu0 }
 0x14d   : > { %1624 = vst.msk [vmem:[%s2655_s24 + $0x98] sm:$0xff] %vm308_vm0, %v1972_v33  ;;  %1621 = vst.msk [vmem:[%s2655_s24 + $0x80] sm:$0xff] %vm308_vm0, %v1029_v34  ;;  %v1110_v35 = vpop.f32.mrb[9].mxu1 }
 0x14e   : > { %1623 = vst.msk [vmem:[%s2655_s24 + $0x90] sm:$0xff] %vm308_vm0, %v1110_v35 }
 0x14f   : > { %v1979_v36 = vpop.f32.mrb[10].mxu0 }
 0x150   : > { %1626 = vst.msk [vmem:[%s2655_s24 + $0xa8] sm:$0xff] %vm308_vm0, %v1979_v36  ;;  %v1986_v37 = vpop.f32.mrb[10].mxu1  ;;  %v1191_v38 = vpop.f32.mrb[11].mxu0 }
 0x151   : > { %1628 = vst.msk [vmem:[%s2655_s24 + $0xb8] sm:$0xff] %vm308_vm0, %v1986_v37  ;;  %1625 = vst.msk [vmem:[%s2655_s24 + $0xa0] sm:$0xff] %vm308_vm0, %v1191_v38  ;;  %v1272_v39 = vpop.f32.mrb[11].mxu1 }
 0x152   : > { %1627 = vst.msk [vmem:[%s2655_s24 + $0xb0] sm:$0xff] %vm308_vm0, %v1272_v39 }
 0x153   : > { %v1993_v40 = vpop.f32.mrb[12].mxu0 }
 0x154   : > { %1630 = vst.msk [vmem:[%s2655_s24 + $0xc8] sm:$0xff] %vm308_vm0, %v1993_v40  ;;  %v2000_v41 = vpop.f32.mrb[12].mxu1  ;;  %v1353_v42 = vpop.f32.mrb[13].mxu0 }
 0x155   : > { %1632 = vst.msk [vmem:[%s2655_s24 + $0xd8] sm:$0xff] %vm308_vm0, %v2000_v41  ;;  %1629 = vst.msk [vmem:[%s2655_s24 + $0xc0] sm:$0xff] %vm308_vm0, %v1353_v42  ;;  %v1434_v43 = vpop.f32.mrb[13].mxu1 }
 0x156   : > { %1631 = vst.msk [vmem:[%s2655_s24 + $0xd0] sm:$0xff] %vm308_vm0, %v1434_v43 }
 0x157   : > { %v2007_v44 = vpop.f32.mrb[14].mxu0 }
 0x158   : > { %1634 = vst.msk [vmem:[%s2655_s24 + $0xe8] sm:$0xff] %vm308_vm0, %v2007_v44  ;;  %v2014_v45 = vpop.f32.mrb[14].mxu1  ;;  %v1515_v46 = vpop.f32.mrb[15].mxu0 }
 0x159   : > { %1636 = vst.msk [vmem:[%s2655_s24 + $0xf8] sm:$0xff] %vm308_vm0, %v2014_v45  ;;  %1633 = vst.msk [vmem:[%s2655_s24 + $0xe0] sm:$0xff] %vm308_vm0, %v1515_v46  ;;  %v1596_v47 = vpop.f32.mrb[15].mxu1 }
 0x15a   : > { %1635 = vst.msk [vmem:[%s2655_s24 + $0xf0] sm:$0xff] %vm308_vm0, %v1596_v47 }
 0x15b   : > { %2239 = shalt.err (!%p2236_p12)
}
 0x15c   : > { %s2240_s18 = scalar_lea.hbm %s2719_s23, 4096  ;;  %s2244_s29 = scalar_lea.hbm %s2785_s2, 16384 }
 0x15d   : > { %p2241_p10 = scmp.ne.s32.totalorder %s2719_s23, %s2240_s18  ;;  %p2245_p3 = scmp.lt.u32.totalorder %s2719_s23, %s2785_s2 }
 0x15e   : > { %p2246_p5 = scmp.lt.u32.totalorder %s2244_s29, %s2240_s18  ;;  %p2248_p0 = scmp.lt.u32.totalorder %s2240_s18, %s2719_s23 }
 0x15f   : > { %p2242_p11 = pnand %p2241_p10, %p2801_p2 }
 0x160   : > { %p2247_p8 = por %p2246_p5, %p2245_p3 }
 0x161   : > { %p2243_p1 = pneg %p2242_p11 }
 0x162   : > { %p2249_p4 = por %p2248_p0, %p2247_p8 }
 0x164   : > { %p2250_p13 = pnand %p2249_p4, %p2243_p1 }
 0x166   : > { %2253 = shalt.err (!%p2250_p13)
}
 0x167   : > { %s2335_s6 = smov 128   ;;  %s2336_s3 = smov 8  }
 0x168   : > { %2083 = dma.vmem_to_hbm [thread:$0]  (%p2801_p2), %s2721_s13, 4096, %s2719_s23, %s1638_s0, %s2335_s6, %s2335_s6, %s2336_s3  }
 0x169 PF: > { %p2097_p6 = scmp.ge.s32.totalorder %s2328_s16, 2  ;;  %s1671_s12 = sand.u32 1, %s2300_s9  }
 0x16a   : > { %p2802_p7 = scmp.ne.s32.totalorder %s2795_s28, 0  ;;  %s1672_s5 = scalar_lea.sflag [#allocation4], %s1671_s12 }
 0x16c   : > { %p2093_p9 = pnand %p2097_p6, %p2802_p7 }
 0x16e   : > { %2295 = dma.done.wait (!%p2093_p9), %s1672_s5, 4096  }
 0x16f   : > { %2297 = vsyncadd (!%p2093_p9), %s1672_s5, 4294963200  ;;  %s21_s16 = sadd.s32 1, %s2328_s16   ;;  %s2803_s25 = sld [smem:[#allocation11_spill]] }
 0x170   : > { %p18_p12 = scmp.ge.s32.totalorder %s21_s16, 6   ;;  %s2804_s9 = smov %s2304_s10 }
 0x171   : > { %s2805_s10 = smov %s2308_s11  ;;  %s2806_s11 = smov %s2432_s30 }
 0x172   : > { %s2807_s12 = smov %s2320_s14  ;;  %s2808_s13 = smov %s2324_s15 }
 0x173   : > { %s2809_s14 = smov %s2812_s19  ;;  %20 = sbr.rel (!%p18_p12) target bundleno = 11 (0xb), region = 86 }
 0x175   : > { %s2810_s15 = smov %s2803_s25 }
 0x17a   :  { %1677 = vsyncpa [#allocation3], 1 }
 0x17b   :  { %1679 = vsyncpa [#allocation3 + $0x1], 1 }
 0x17c   :  { %1680 = vsyncpa [#allocation6], 1 }
 0x17d   :  { %1682 = vsyncpa [#allocation6 + $0x1], 1 }
 0x17e   :  { %1683 = vsyncpa [#allocation4], 1 }
 0x17f   :  { %1685 = vsyncpa [#allocation4 + $0x1], 1 }

// kernel: regular_block_forward.3
= control target key start
LH: loop header
LB: loop body
LE: loop exit
PB: predicated region body
PF: predicated region fallthrough
CT: control target
= control target key end

     0   :  { %s2468_s0 = inlined_call_operand.hbm [shape: f32[2,4,256], index: 0, kind: input, shape index: {}]   ;;  %s2469_s1 = inlined_call_operand.hbm [shape: f32[64,4], index: 1, kind: input, shape index: {}]   ;;  %s2470_s2 = inlined_call_operand.hbm [shape: f32[64,1], index: 2, kind: input, shape index: {}]   ;;  %s2471_s3 = inlined_call_operand.hbm [shape: f32[32,32], index: 3, kind: input, shape index: {}]   ;;  %s2472_s4 = inlined_call_operand.hbm [shape: f32[32,1], index: 4, kind: input, shape index: {}]   ;;  %s2473_s5 = inlined_call_operand.hbm [shape: f32[32,32], index: 5, kind: input, shape index: {}]   ;;  %s2474_s6 = inlined_call_operand.hbm [shape: f32[32,1], index: 6, kind: input, shape index: {}]   ;;  %s2475_s7 = inlined_call_operand.hbm [shape: f32[2,1,256], index: 7, kind: input, shape index: {}]   ;;  %s2476_s8 = inlined_call_operand.hbm [shape: f32[2,32,256], index: 8, kind: output, shape index: {0}]   ;;  %s2477_s9 = inlined_call_operand.hbm [shape: f32[2,32,256], index: 9, kind: output, shape index: {1}]  }
   0x1   :  { %2488 = sst [smem:[#allocation29_spill]] %s2469_s1 }
   0x2   :  { %2489 = sst [smem:[#allocation30_spill]] %s2470_s2 }
   0x3   :  { %2490 = sst [smem:[#allocation31_spill]] %s2471_s3 }
   0x4   :  { %2491 = sst [smem:[#allocation32_spill]] %s2472_s4 }
   0x5   :  { %2492 = sst [smem:[#allocation33_spill]] %s2473_s5 }
   0x6   :  { %2493 = sst [smem:[#allocation34_spill]] %s2476_s8 }
   0x7   :  { %2494 = sst [smem:[#allocation35_spill]] %s2477_s9 }
   0x8   :  { %15 = vsyncpa [#allocation3], 0 }
   0x9   :  { %17 = vsyncpa [#allocation3 + $0x1], 0 }
   0xa   :  { %18 = vsyncpa [#allocation6], 0 }
   0xb   :  { %19 = vsyncpa [#allocation9], 0 }
   0xc   :  { %20 = vsyncpa [#allocation12], 0 }
   0xd   :  { %21 = vsyncpa [#allocation15], 0 }
   0xe   :  { %23 = vsyncpa [#allocation15 + $0x1], 0 }
   0xf   :  { %24 = vsyncpa [#allocation4], 0 }
  0x10   :  { %26 = vsyncpa [#allocation4 + $0x1], 0 }
  0x11   :  { %27 = vsyncpa [#allocation18], 0 }
  0x12   :  { %29 = vsyncpa [#allocation18 + $0x1], 0  ;;  %s1960_s30 = smov 0   ;;  %s1962_s10 = smov 0  }
  0x13   :  { %s1964_s11 = smov 0   ;;  %s1966_s12 = smov 0  }
  0x14   :  { %s1968_s13 = smov 0   ;;  %s1970_s14 = smov 0  }
  0x15   :  { %s1972_s15 = smov 0   ;;  %s1974_s16 = smov 0  }
  0x16 LB: > { %2495 = sst [smem:[#allocation26_spill]] %s1876_s12  ;;  %s2478_s17 = sadd.s32 4294967295, %s1892_s16   ;;  %s1892_s16 = sphi %s1974_s16, %s35_s16   ;;  %s1888_s15 = sphi %s1972_s15, %s2531_s15   ;;  %s1884_s14 = sphi %s1970_s14, %s2530_s14   ;;  %s1880_s13 = sphi %s1968_s13, %s2529_s13   ;;  %s1876_s12 = sphi %s1966_s12, %s2528_s12   ;;  %s1872_s11 = sphi %s1964_s11, %s2527_s11   ;;  %s1868_s10 = sphi %s1962_s10, %s2526_s10   ;;  %s1864_s30 = sphi %s1960_s30, %s2525_s30  }
  0x17   : > { %2496 = sst [smem:[#allocation27_spill]] %s1880_s13  ;;  %p1225_p0 = scmp.ge.s32.totalorder %s1892_s16, 1 }
  0x18   : > { %p2004_p1 = scmp.eq.s32.totalorder %s2478_s17, 0  ;;  %p290_p2 = scmp.lt.s32.totalorder %s1892_s16, 5 }
  0x19   : > { %s1894_s20 = smov [#allocation5]   ;;  %s1895_s23 = smov [#allocation8]  }
  0x1a   : > { %s2497_s18 = scalar_select %p2004_p1, 1, 0 }
  0x1b   : > { %p2009_p3 = pnand %p1225_p0, %p290_p2  ;;  %s302_s21 = sshll.u32 %s1894_s20, 4  ;;  %s2013_s21 = int_to_ptr.vmem [resolvable:$true] %s302_s21 }
  0x1c   : > { %s328_s24 = sshll.u32 %s1895_s23, 4  ;;  %s1896_s25 = smov [#allocation11]   ;;  %s2023_s24 = int_to_ptr.vmem [resolvable:$true] %s328_s24 }
  0x1d   : > { %s2498_s19 = scalar_select %p2009_p3, 1, 0 }
  0x1e   : > { %p1393_p4 = pneg %p2009_p3  ;;  %s2025_s26 = sshll.u32 %s1896_s25, 4  ;;  %s355_s26 = int_to_ptr.vmem [resolvable:$true] %s2025_s26 }
  0x1f   : > { %2499 = sst [smem:[#allocation28_spill]] %s2498_s19  ;;  %s2501_s1 = sld [smem:[#allocation29_spill]] }
  0x20   : > { %p2019_p5 = pnand %p1393_p4, %p2004_p1 }
  0x22   : > { %p2035_p7 = pneg %p2019_p5 }
  0x25   : > { %s1518_s29 = scalar_lea.hbm %s2501_s1, 1024 }
  0x26   : > { %p1519_p6 = scmp.ne.s32.totalorder %s2501_s1, %s1518_s29  ;;  %p1525_p10 = scmp.lt.u32.totalorder %s1518_s29, %s2501_s1 }
  0x28   : > { %p1521_p8 = pnand %p2035_p7, %p1519_p6 }
  0x2a   : > { %p1522_p9 = pneg %p1521_p8 }
  0x2c   : > { %p1527_p11 = pnand %p1525_p10, %p1522_p9 }
  0x2e   : > { %1530 = shalt.err (!%p1527_p11)
}
  0x2f   : > { %s1531_s17 = scalar_lea.vmem %s2013_s21, 1024  ;;  %p1539_p2 = scmp.lt.s32.totalorder %s2013_s21, %s2013_s21 }
  0x30   : > { %p1532_p12 = scmp.ne.s32.totalorder %s2013_s21, %s1531_s17  ;;  %p1540_p4 = scmp.lt.s32.totalorder %s1531_s17, %s1531_s17 }
  0x32   : > { %p1534_p13 = pnand %p1532_p12, %p2035_p7  ;;  %p1541_p6 = por %p1540_p4, %p1539_p2 }
  0x34   : > { %p1535_p0 = pneg %p1534_p13 }
  0x36   : > { %p1542_p8 = pnand %p1541_p6, %p1535_p0 }
  0x38   : > { %1545 = shalt.err (!%p1542_p8)
}
  0x39   : > { %s1897_s27 = smov 128   ;;  %s1898_s28 = smov 8  }
  0x3a   : > { %1396 = dma.hbm_to_vmem [thread:$0]  (!%p2019_p5), %s2501_s1, 1024, %s2013_s21, [#allocation6], %s1897_s27, %s1897_s27, %s1898_s28  }
  0x3b   : > { %s2503_s3 = sld [smem:[#allocation31_spill]] }
  0x41   : > { %s1546_s17 = scalar_lea.hbm %s2503_s3, 512 }
  0x42   : > { %p1547_p9 = scmp.ne.s32.totalorder %s2503_s3, %s1546_s17  ;;  %p1553_p12 = scmp.lt.u32.totalorder %s1546_s17, %s2503_s3 }
  0x44   : > { %p1549_p10 = pnand %p1547_p9, %p2035_p7 }
  0x46   : > { %p1550_p11 = pneg %p1549_p10 }
  0x48   : > { %p1555_p13 = pnand %p1553_p12, %p1550_p11 }
  0x4a   : > { %1558 = shalt.err (!%p1555_p13)
}
  0x4b   : > { %s1559_s21 = scalar_lea.vmem %s2023_s24, 512  ;;  %p1567_p6 = scmp.lt.s32.totalorder %s2023_s24, %s2023_s24 }
  0x4c   : > { %p1560_p0 = scmp.ne.s32.totalorder %s2023_s24, %s1559_s21  ;;  %p1568_p8 = scmp.lt.s32.totalorder %s1559_s21, %s1559_s21 }
  0x4e   : > { %p1562_p2 = pnand %p1560_p0, %p2035_p7  ;;  %p1569_p9 = por %p1568_p8, %p1567_p6 }
  0x50   : > { %p1563_p4 = pneg %p1562_p2 }
  0x52   : > { %p1570_p10 = pnand %p1569_p9, %p1563_p4 }
  0x54   : > { %1573 = shalt.err (!%p1570_p10)
}
  0x55   : > { %1402 = dma.hbm_to_vmem [thread:$0]  (!%p2019_p5), %s2503_s3, 512, %s2023_s24, [#allocation9], %s1897_s27, %s1897_s27, %s1898_s28  }
  0x56   : > { %s2504_s5 = sld [smem:[#allocation33_spill]] }
  0x5c   : > { %s1574_s29 = scalar_lea.hbm %s2504_s5, 512 }
  0x5d   : > { %p1575_p11 = scmp.ne.s32.totalorder %s2504_s5, %s1574_s29  ;;  %p1581_p0 = scmp.lt.u32.totalorder %s1574_s29, %s2504_s5 }
  0x5f   : > { %p1577_p12 = pnand %p1575_p11, %p2035_p7 }
  0x61   : > { %p1578_p13 = pneg %p1577_p12 }
  0x63   : > { %p1583_p2 = pnand %p1581_p0, %p1578_p13 }
  0x65   : > { %1586 = shalt.err (!%p1583_p2)
}
  0x66   : > { %s1587_s21 = scalar_lea.vmem %s355_s26, 512  ;;  %p1595_p9 = scmp.lt.s32.totalorder %s355_s26, %s355_s26 }
  0x67   : > { %p1588_p4 = scmp.ne.s32.totalorder %s355_s26, %s1587_s21  ;;  %p1596_p10 = scmp.lt.s32.totalorder %s1587_s21, %s1587_s21 }
  0x69   : > { %p1590_p6 = pnand %p1588_p4, %p2035_p7  ;;  %p1597_p3 = por %p1596_p10, %p1595_p9 }
  0x6b   : > { %p1591_p8 = pneg %p1590_p6 }
  0x6d   : > { %p1598_p1 = pnand %p1597_p3, %p1591_p8 }
  0x6f   : > { %1601 = shalt.err (!%p1598_p1)
}
  0x70   : > { %1408 = dma.hbm_to_vmem [thread:$0]  (!%p2019_p5), %s2504_s5, 512, %s355_s26, [#allocation12], %s1897_s27, %s1897_s27, %s1898_s28  }
  0x71   : > { %s1899_s12 = smov [#allocation7]   ;;  %s1900_s19 = smov [#allocation10]  }
  0x72   : > { %s315_s13 = sshll.u32 %s1899_s12, 4  ;;  %s341_s29 = sshll.u32 %s1900_s19, 4  ;;  %s316_s13 = int_to_ptr.vmem [resolvable:$true] %s315_s13  ;;  %s342_s29 = int_to_ptr.vmem [resolvable:$true] %s341_s29 }
  0x73   : > { %s2505_s2 = sld [smem:[#allocation30_spill]] }
  0x79   : > { %s1602_s25 = scalar_lea.hbm %s2505_s2, 1024 }
  0x7a   : > { %p1603_p1 = scmp.ne.s32.totalorder %s2505_s2, %s1602_s25  ;;  %p1609_p12 = scmp.lt.u32.totalorder %s1602_s25, %s2505_s2 }
  0x7c   : > { %p1605_p3 = pnand %p1603_p1, %p2035_p7 }
  0x7e   : > { %p1606_p11 = pneg %p1605_p3 }
  0x80   : > { %p1611_p13 = pnand %p1609_p12, %p1606_p11 }
  0x82   : > { %1614 = shalt.err (!%p1611_p13)
}
  0x83   : > { %s1615_s26 = scalar_lea.vmem %s316_s13, 1024  ;;  %p1623_p6 = scmp.lt.s32.totalorder %s316_s13, %s316_s13 }
  0x84   : > { %p1616_p0 = scmp.ne.s32.totalorder %s316_s13, %s1615_s26  ;;  %p1624_p8 = scmp.lt.s32.totalorder %s1615_s26, %s1615_s26 }
  0x86   : > { %p1618_p2 = pnand %p1616_p0, %p2035_p7  ;;  %p1625_p9 = por %p1624_p8, %p1623_p6 }
  0x88   : > { %p1619_p4 = pneg %p1618_p2 }
  0x8a   : > { %p1626_p10 = pnand %p1625_p9, %p1619_p4 }
  0x8c   : > { %1629 = shalt.err (!%p1626_p10)
}
  0x8d   : > { %1399 = dma.hbm_to_vmem [thread:$0]  (!%p2019_p5), %s2505_s2, 1024, %s316_s13, [#allocation6], %s1897_s27, %s1897_s27, %s1898_s28  }
  0x8e   : > { %s2506_s4 = sld [smem:[#allocation32_spill]] }
  0x94   : > { %s1630_s20 = scalar_lea.hbm %s2506_s4, 512 }
  0x95   : > { %p1631_p1 = scmp.ne.s32.totalorder %s2506_s4, %s1630_s20  ;;  %p1637_p12 = scmp.lt.u32.totalorder %s1630_s20, %s2506_s4 }
  0x97   : > { %p1633_p3 = pnand %p1631_p1, %p2035_p7 }
  0x99   : > { %p1634_p11 = pneg %p1633_p3 }
  0x9b   : > { %p1639_p13 = pnand %p1637_p12, %p1634_p11 }
  0x9d   : > { %1642 = shalt.err (!%p1639_p13)
}
  0x9e   : > { %s1643_s24 = scalar_lea.vmem %s342_s29, 512  ;;  %p1651_p6 = scmp.lt.s32.totalorder %s342_s29, %s342_s29 }
  0x9f   : > { %p1644_p0 = scmp.ne.s32.totalorder %s342_s29, %s1643_s24  ;;  %p1652_p8 = scmp.lt.s32.totalorder %s1643_s24, %s1643_s24 }
  0xa1   : > { %p1646_p2 = pnand %p1644_p0, %p2035_p7  ;;  %p1653_p9 = por %p1652_p8, %p1651_p6 }
  0xa3   : > { %p1647_p4 = pneg %p1646_p2 }
  0xa5   : > { %p1654_p10 = pnand %p1653_p9, %p1647_p4 }
  0xa7   : > { %1657 = shalt.err (!%p1654_p10)
}
  0xa8   : > { %1405 = dma.hbm_to_vmem [thread:$0]  (!%p2019_p5), %s2506_s4, 512, %s342_s29, [#allocation9], %s1897_s27, %s1897_s27, %s1898_s28  }
  0xa9   : > { %s1901_s1 = smov [#allocation13]   ;;  %s1658_s20 = scalar_lea.hbm %s2474_s6, 512 }
  0xaa   : > { %s367_s8 = sshll.u32 %s1901_s1, 4  ;;  %p1659_p1 = scmp.ne.s32.totalorder %s2474_s6, %s1658_s20  ;;  %s368_s8 = int_to_ptr.vmem [resolvable:$true] %s367_s8 }
  0xab   : > { %p1665_p12 = scmp.lt.u32.totalorder %s1658_s20, %s2474_s6 }
  0xac   : > { %p1661_p3 = pnand %p1659_p1, %p2035_p7 }
  0xae   : > { %p1662_p11 = pneg %p1661_p3 }
  0xb0   : > { %p1667_p13 = pnand %p1665_p12, %p1662_p11 }
  0xb2   : > { %1670 = shalt.err (!%p1667_p13)
}
  0xb3   : > { %s1671_s29 = scalar_lea.vmem %s368_s8, 512  ;;  %p1679_p6 = scmp.lt.s32.totalorder %s368_s8, %s368_s8 }
  0xb4   : > { %p1672_p0 = scmp.ne.s32.totalorder %s368_s8, %s1671_s29  ;;  %p1680_p8 = scmp.lt.s32.totalorder %s1671_s29, %s1671_s29 }
  0xb6   : > { %p1674_p2 = pnand %p1672_p0, %p2035_p7  ;;  %p1681_p9 = por %p1680_p8, %p1679_p6 }
  0xb8   : > { %p1675_p4 = pneg %p1674_p2 }
  0xba   : > { %p1682_p10 = pnand %p1681_p9, %p1675_p4 }
  0xbc   : > { %1685 = shalt.err (!%p1682_p10)
}
  0xbd   : > { %1411 = dma.hbm_to_vmem [thread:$0]  (!%p2019_p5), %s2474_s6, 512, %s368_s8, [#allocation12], %s1897_s27, %s1897_s27, %s1898_s28  }
  0xbe   : > { %s1224_s9 = sadd.s32 4294967294, %s1892_s16   ;;  %s44_s22 = sadd.s32 1, %s1884_s14 }
  0xbf   : > { %p45_p7 = scmp.ge.s32.totalorder %s44_s22, 2  ;;  %s47_s26 = sadd.s32 1, %s1888_s15 }
  0xc0   : > { %s56_s1 = sadd.s32 1, %s1872_s11  ;;  %p63_p1 = scmp.ne.s32.totalorder %s1872_s11, %s1868_s10 }
  0xc1   : > { %s2533_s22 = smov (%p45_p7, %s44_s22), 0  ;;  %s2535_s26 = smov (!%p45_p7, %s47_s26), %s1888_s15 }
  0xc2   : > { %s52_s12 = ssub.s32 %s1884_s14, %s2533_s22  ;;  %p64_p3 = scmp.eq.s32.totalorder %s1892_s16, 0 }
  0xc3   : > { %p49_p11 = scmp.ge.s32.totalorder %s2535_s26, 2  ;;  %p69_p5 = scmp.ne.s32.totalorder %s1868_s10, %s1864_s30 }
  0xc4   : > { %p2184_p12 = por %p64_p3, %p63_p1  ;;  %s2508_s28 = sadd.s32 4294967295, %s1892_s16  }
  0xc5   : > { %p249_p13 = scmp.eq.s32.totalorder %s2508_s28, 3  ;;  %s2537_s26 = smov (%p49_p11, %s2535_s26), 0 }
  0xc6   : > { %p2509_p0 = scmp.ne.s32.totalorder %s2497_s18, 0  ;;  %s51_s20 = ssub.s32 %s1888_s15, %s2537_s26 }
  0xc7   : > { %p2198_p4 = por %p249_p13, %p63_p1  ;;  %p255_p6 = scmp.eq.s32.totalorder %s1224_s9, 3 }
  0xc8   : > { %p2194_p2 = por %p2509_p0, %p69_p5  ;;  %s53_s23 = sor.u32 %s52_s12, %s51_s20 }
  0xc9   : > { %s2511_s19 = scalar_select %p2198_p4, 1, 0 }
  0xca   : > { %s2510_s8 = scalar_select %p2194_p2, 1, 0 }
  0xcb   : > { %p1432_p8 = scmp.lt.s32.totalorder %s1892_s16, 4  ;;  %p54_p9 = scmp.eq.s32.totalorder %s53_s23, 0 }
  0xcc   : > { %p2205_p10 = por %p255_p6, %p69_p5  ;;  %s2210_s17 = sand.u32 1, %s1872_s11  }
  0xcd   : > { %s1234_s21 = sshll.u32 %s1888_s15, 1  ;;  %s1233_s24 = sshll.u32 %s2210_s17, 2 }
  0xce   : > { %s2512_s25 = scalar_select %p2205_p10, 1, 0 }
  0xcf   : > { %s2214_s29 = scalar_select %p54_p9, %s1872_s11, %s56_s1  }
  0xd0   : > { %s390_s13 = sadd.s32 %s1884_s14, %s1234_s21  ;;  %s385_s2 = scalar_lea.vmem [#allocation2], %s1233_s24 }
  0xd1   : > { %s1235_s28 = sshll.u32 %s390_s13, 6  ;;  %s394_s3 = sshll.u32 %s385_s2, 4  ;;  %s2223_s3 = int_to_ptr.vmem [resolvable:$true] %s394_s3 }
  0xd2   : > { %s2221_s20 = scalar_lea.hbm %s2468_s0, %s1235_s28  ;;  %p2229_p7 = pnand %p1432_p8, %p2184_p12 }
  0xd3   : > { %s1237_s2 = sshll.u32 %s390_s13, 4  ;;  %s382_s28 = scalar_lea.sflag [#allocation3], %s2210_s17 }
  0xd4   : > { %s2236_s24 = scalar_lea.hbm %s2475_s7, %s1237_s2  ;;  %s1686_s9 = scalar_lea.hbm %s2221_s20, 64 }
  0xd5   : > { %p1687_p1 = scmp.ne.s32.totalorder %s2221_s20, %s1686_s9  ;;  %p1688_p3 = pneg %p2229_p7 }
  0xd6   : > { %s1691_s4 = scalar_lea.hbm %s2468_s0, 256  ;;  %p1692_p12 = scmp.lt.u32.totalorder %s2221_s20, %s2468_s0 }
  0xd7   : > { %p1689_p11 = pnand %p1688_p3, %p1687_p1  ;;  %p1693_p13 = scmp.lt.u32.totalorder %s1691_s4, %s1686_s9 }
  0xd8   : > { %p1695_p6 = scmp.lt.u32.totalorder %s1686_s9, %s2221_s20 }
  0xd9   : > { %p1690_p5 = pneg %p1689_p11  ;;  %p1694_p0 = por %p1693_p13, %p1692_p12 }
  0xdb   : > { %p1696_p8 = por %p1695_p6, %p1694_p0 }
  0xdd   : > { %p1697_p9 = pnand %p1696_p8, %p1690_p5 }
  0xdf   : > { %1700 = shalt.err (!%p1697_p9)
}
  0xe0   : > { %s1701_s2 = scalar_lea.vmem %s2223_s3, 64  ;;  %s1902_s23 = smov [#allocation2]  }
  0xe1   : > { %p1702_p1 = scmp.ne.s32.totalorder %s2223_s3, %s1701_s2  ;;  %s1706_s21 = sshll.u32 %s1902_s23, 4  ;;  %s1707_s21 = int_to_ptr.vmem [resolvable:$false] %s1706_s21 }
  0xe2   : > { %s1708_s5 = scalar_lea.vmem %s1707_s21, 128  ;;  %p1709_p4 = scmp.lt.s32.totalorder %s2223_s3, %s1707_s21 }
  0xe3   : > { %p1704_p11 = pnand %p1702_p1, %p1688_p3  ;;  %p1710_p12 = scmp.lt.s32.totalorder %s1708_s5, %s1701_s2 }
  0xe5   : > { %p1705_p10 = pneg %p1704_p11  ;;  %p1711_p13 = por %p1710_p12, %p1709_p4 }
  0xe7   : > { %p1712_p0 = pnand %p1711_p13, %p1705_p10 }
  0xe9   : > { %1715 = shalt.err (!%p1712_p0)
}
  0xea   : > { %1415 = dma.hbm_to_vmem [thread:$0]  (!%p2229_p7), %s2221_s20, 64, %s2223_s3, %s382_s28  }
  0xeb   : > { %s404_s4 = scalar_lea.vmem [#allocation14], %s2210_s17  ;;  %s402_s27 = scalar_lea.sflag [#allocation15], %s2210_s17 }
  0xec   : > { %s413_s9 = sshll.u32 %s404_s4, 4  ;;  %s1716_s12 = scalar_lea.hbm %s2236_s24, 16  ;;  %s414_s9 = int_to_ptr.vmem [resolvable:$true] %s413_s9 }
  0xed   : > { %p1717_p4 = scmp.ne.s32.totalorder %s2236_s24, %s1716_s12  ;;  %s1721_s23 = scalar_lea.hbm %s2475_s7, 64 }
  0xee   : > { %p1722_p6 = scmp.lt.u32.totalorder %s2236_s24, %s2475_s7  ;;  %p1723_p8 = scmp.lt.u32.totalorder %s1721_s23, %s1716_s12 }
  0xef   : > { %p1719_p10 = pnand %p1717_p4, %p1688_p3  ;;  %p1725_p1 = scmp.lt.u32.totalorder %s1716_s12, %s2236_s24 }
  0xf0   : > { %p1724_p9 = por %p1723_p8, %p1722_p6 }
  0xf1   : > { %p1720_p5 = pneg %p1719_p10 }
  0xf2   : > { %p1726_p11 = por %p1725_p1, %p1724_p9 }
  0xf4   : > { %p1727_p12 = pnand %p1726_p11, %p1720_p5 }
  0xf6   : > { %1730 = shalt.err (!%p1727_p12)
}
  0xf7   : > { %s1731_s3 = scalar_lea.vmem %s414_s9, 16  ;;  %s1903_s17 = smov [#allocation14]  }
  0xf8   : > { %p1732_p13 = scmp.ne.s32.totalorder %s414_s9, %s1731_s3  ;;  %s1736_s20 = sshll.u32 %s1903_s17, 4  ;;  %s1737_s20 = int_to_ptr.vmem [resolvable:$false] %s1736_s20 }
  0xf9   : > { %s1738_s28 = scalar_lea.vmem %s1737_s20, 32  ;;  %p1739_p10 = scmp.lt.s32.totalorder %s414_s9, %s1737_s20 }
  0xfa   : > { %p1734_p0 = pnand %p1732_p13, %p1688_p3  ;;  %p1740_p2 = scmp.lt.s32.totalorder %s1738_s28, %s1731_s3 }
  0xfc   : > { %p1735_p4 = pneg %p1734_p0  ;;  %p1741_p6 = por %p1740_p2, %p1739_p10 }
  0xfe   : > { %p1742_p8 = pnand %p1741_p6, %p1735_p4 }
 0x100   : > { %1745 = shalt.err (!%p1742_p8)
}
 0x101   : > { %1418 = dma.hbm_to_vmem [thread:$0]  (!%p2229_p7), %s2236_s24, 16, %s414_s9, %s402_s27  }
 0x102   : > { %s2514_s4 = sld [smem:[#allocation28_spill]] }
 0x108   : > { %p2515_p5 = scmp.ne.s32.totalorder %s2514_s4, 0 }
 0x109   : > { %s2288_s12 = sand.u32 (!%p2515_p5), 1, %s1868_s10   ;;  %p2516_p3 = scmp.ne.s32.totalorder (!%p2515_p5), %s2510_s8, 0 }
 0x10a   : > { %422 = sbr.rel (%p2515_p5) target bundleno = 779 (0x30b), region = 52  ;;  %s1239_s13 = sshll.u32 (!%p2515_p5), %s2288_s12, 2 }
 0x10b   : > { %s425_s2 = scalar_lea.sflag (!%p2515_p5), [#allocation3], %s2288_s12  ;;  %s428_s23 = scalar_lea.vmem (!%p2515_p5), [#allocation2], %s1239_s13 }
 0x111   : > { %1835 = dma.done.wait (%p2516_p3), %s425_s2, 64  }
 0x112   : > { %1837 = vsyncadd (%p2516_p3), %s425_s2, 4294967232  ;;  %p2517_p2 = scmp.ne.s32.totalorder %s2497_s18, 0 }
 0x114   : > { %1839 = dma.done.wait (%p2517_p2), [#allocation6], 2048  }
 0x115   : > { %1841 = vsyncadd (%p2517_p2), [#allocation6], 4294965248 }
 0x116   : > { %1843 = dma.done.wait (%p2517_p2), [#allocation9], 1024  }
 0x117   : > { %1845 = vsyncadd (%p2517_p2), [#allocation9], 4294966272 }
 0x118   : > { %1847 = dma.done.wait (%p2517_p2), [#allocation12], 1024  }
 0x119   : > { %1849 = vsyncadd (%p2517_p2), [#allocation12], 4294966272  ;;  %s458_s1 = scalar_lea.sflag [#allocation15], %s2288_s12  ;;  %s460_s24 = scalar_lea.vmem [#allocation14], %s2288_s12 }
 0x11a   : > { %1851 = dma.done.wait (%p2516_p3), %s458_s1, 16  }
 0x11b   : > { %1853 = vsyncadd (%p2516_p3), %s458_s1, 4294967280  ;;  %v1904_v0 = vmov 0   ;;  %vm587_vm0 = vcmask 1043456   ;;  %vm562_vm1 = vcmask 31744   ;;  %v504_v1 = vld [vmem:[%s428_s23] sm:$0xf] }
 0x11c   : > { %1517 = vset.pattern.permute.xlu1 %v1904_v0  ;;  %1516 = vset.pattern.permute.xlu0 %v1904_v0  ;;  %v506_v2 = vld [vmem:[#allocation5] sm:$0xff]  ;;  %v507_v3 = vld [vmem:[#allocation5 + $0x8] sm:$0xff]  ;;  %v508_v4 = vld [vmem:[#allocation5 + $0x10] sm:$0xff]  ;;  %vm732_vm2 = vcmask 261120   ;;  %s2518_s18 = sld [smem:[#allocation27_spill]]  ;;  %s2519_s8 = sld [smem:[#allocation26_spill]] }
 0x11d   : > { %1299 = vmatprep.subr.msk.mxu0 %vm587_vm0, %v504_v1  ;;  %1301 = vmatprep.mubr.msk.f32.mxu0 %vm562_vm1, %v506_v2  ;;  %v516_v5 = vld [vmem:[#allocation7 + $0x10] sm:$0xff]  ;;  %v514_v6 = vld [vmem:[#allocation7] sm:$0xff]  ;;  %v509_v7 = vld [vmem:[#allocation5 + $0x18] sm:$0xff]  ;;  %s1246_s9 = sshll.u32 %s2288_s12, 5  ;;  %s2520_s4 = sld [smem:[#allocation34_spill]] }
 0x11e   : > { %1300 = vmatpush3.msk.msra.mxu0 %vm587_vm0, %v504_v1  ;;  %534 = vperm.xlu1 %1517, %v516_v5   ;;  %v510_v8 = vld [vmem:[#allocation5 + $0x20] sm:$0xff]  ;;  %v517_v9 = vld [vmem:[#allocation7 + $0x18] sm:$0xff]  ;;  %v515_v10 = vld [vmem:[#allocation7 + $0x8] sm:$0xff]  ;;  %s2341_s5 = scalar_lea.vmem [#allocation16], %s1246_s9  ;;  %s2363_s2 = scalar_lea.vmem [#allocation17], %s1246_s9 }
 0x11f   : > { %1302 = vmatmul.mubr.msk.f32.vlgmr.msra.gmra.mrb[0].mxu0 %vm562_vm1, %v507_v3  ;;  %524 = vperm.xlu0 %1516, %v514_v6   ;;  %v511_v11 = vld [vmem:[#allocation5 + $0x28] sm:$0xff]  ;;  %v512_v12 = vld [vmem:[#allocation5 + $0x30] sm:$0xff]  ;;  %v518_v14 = vld [vmem:[#allocation7 + $0x20] sm:$0xff]  ;;  %s1005_s3 = sshll.u32 %s2341_s5, 4  ;;  %s1022_s23 = sshll.u32 %s2363_s2, 4  ;;  %s2348_s3 = int_to_ptr.vmem [resolvable:$true] %s1005_s3  ;;  %s2397_s23 = int_to_ptr.vmem [resolvable:$true] %s1022_s23 }
 0x120   : > { %1304 = vmatprep.mubr.msk.f32.mxu0 %vm562_vm1, %v508_v4  ;;  %v519_v13 = vld [vmem:[#allocation7 + $0x28] sm:$0xff]  ;;  %v513_v15 = vld [vmem:[#allocation5 + $0x38] sm:$0xff]  ;;  %v520_v17 = vld [vmem:[#allocation7 + $0x30] sm:$0xff]  ;;  %s986_s1 = scalar_lea.sflag [#allocation4], %s2288_s12  ;;  %p2521_p9 = scmp.ne.s32.totalorder %s2511_s19, 0 }
 0x121   : > { %v521_v16 = vld [vmem:[#allocation7 + $0x38] sm:$0xff]  ;;  %v709_v18 = vld [vmem:[#allocation10 + $0x8] sm:$0xff]  ;;  %v708_v19 = vld [vmem:[#allocation10] sm:$0xff] }
 0x122   : > { %539 = vperm.xlu1 %1517, %v517_v9   ;;  %v711_v20 = vld [vmem:[#allocation10 + $0x18] sm:$0xff]  ;;  %v710_v21 = vld [vmem:[#allocation10 + $0x10] sm:$0xff]  ;;  %v839_v22 = vld [vmem:[#allocation13 + $0x8] sm:$0xff]  ;;  %s1268_s27 = sshll.u32 %s2518_s18, 3  ;;  %s1905_s18 = smov [#allocation16]  }
 0x123   : > { %1305 = vmatmul.mubr.msk.f32.gmra.mrb[2].mxu0 %vm562_vm1, %v509_v7  ;;  %529 = vperm.xlu0 %1516, %v515_v10   ;;  %v838_v23 = vld [vmem:[#allocation13] sm:$0xff]  ;;  %v841_v24 = vld [vmem:[#allocation13 + $0x18] sm:$0xff]  ;;  %v840_v25 = vld [vmem:[#allocation13 + $0x10] sm:$0xff]  ;;  %s2337_s21 = sadd.s32 %s2519_s8, %s1268_s27  ;;  %s1750_s8 = sshll.u32 %s1905_s18, 4  ;;  %s1751_s8 = int_to_ptr.vmem [resolvable:$false] %s1750_s8 }
 0x124   : > { %1307 = vmatprep.mubr.msk.f32.mxu0 %vm562_vm1, %v510_v8  ;;  %v704_v26 = vld [vmem:[#allocation8] sm:$0xff]  ;;  %v705_v59 = vld [vmem:[#allocation8 + $0x8] sm:$0xff]  ;;  %v706_v63 = vld [vmem:[#allocation8 + $0x10] sm:$0xff]  ;;  %s1269_s17 = sshll.u32 %s2337_s21, 7  ;;  %s1752_s9 = scalar_lea.vmem %s1751_s8, 1024 }
 0x125   : > { %1321 = vmatprep.mubr.msk.f32.mxu1 %vm732_vm2, %v704_v26  ;;  %v834_v27 = vld [vmem:[#allocation11] sm:$0xff]  ;;  %v707_v1 = vld [vmem:[#allocation8 + $0x18] sm:$0xff]  ;;  %v836_v3 = vld [vmem:[#allocation11 + $0x10] sm:$0xff]  ;;  %s2357_s13 = scalar_lea.hbm %s2520_s4, %s1269_s17  ;;  %p1753_p12 = scmp.lt.s32.totalorder %s2348_s3, %s1751_s8 }
 0x126   : > { %549 = vperm.xlu1 %1517, %v519_v13   ;;  %v835_v4 = vld [vmem:[#allocation11 + $0x8] sm:$0xff]  ;;  %v837_v5 = vld [vmem:[#allocation11 + $0x18] sm:$0xff] }
 0x127   : > { %1308 = vmatmul.mubr.msk.f32.gmra.mrb[4].mxu0 %vm562_vm1, %v511_v11  ;;  %544 = vperm.xlu0 %1516, %v518_v14   ;;  %v2334_v14 = vld [vmem:[%s460_s24] ss:$0 sm:$0xff]  ;;  %s1746_s24 = scalar_lea.vmem %s2348_s3, 512 }
 0x128   : > { %1310 = vmatprep.mubr.msk.f32.mxu0 %vm562_vm1, %v512_v12  ;;  %p1747_p7 = scmp.ne.s32.totalorder %s2348_s3, %s1746_s24  ;;  %p1754_p13 = scmp.lt.s32.totalorder %s1752_s9, %s1746_s24 }
 0x12a   : > { %559 = vperm.xlu1 %1517, %v521_v16   ;;  %p1748_p1 = pnand %p1747_p7, %p2521_p9  ;;  %p1755_p0 = por %p1754_p13, %p1753_p12 }
 0x12b   : > { %1311 = vmatmul.mubr.msk.f32.gmra.mrb[6].mxu0 %vm562_vm1, %v513_v15  ;;  %554 = vperm.xlu0 %1516, %v520_v17  }
 0x12c   : > { %1335 = vmatprep.mubr.msk.f32.mxu0 %vm732_vm2, %v834_v27  ;;  %p1749_p11 = pneg %p1748_p1 }
 0x12e   : > { %719 = vperm.xlu1 %1517, %v709_v18   ;;  %p1756_p4 = pnand %p1755_p0, %p1749_p11 }
 0x12f   : > { %714 = vperm.xlu0 %1516, %v708_v19  }
 0x132   : > { %729 = vperm.xlu1 %1517, %v711_v20  }
 0x133   : > { %724 = vperm.xlu0 %1516, %v710_v21  }
 0x136   : > { %849 = vperm.xlu1 %1517, %v839_v22  }
 0x137   : > { %844 = vperm.xlu0 %1516, %v838_v23  }
 0x13a   : > { %859 = vperm.xlu1 %1517, %v841_v24  }
 0x13b   : > { %854 = vperm.xlu0 %1516, %v840_v25  }
 0x19d   : > { %v535_v28 = vpop.permute.xlu1 %534 }
 0x19e   : > { %v525_v29 = vpop.permute.xlu0 %524 }
 0x1a1   : > { %v540_v30 = vpop.permute.xlu1 %539 }
 0x1a2   : > { %v530_v31 = vpop.permute.xlu0 %529 }
 0x1a5   : > { %v550_v41 = vpop.permute.xlu1 %549 }
 0x1a6   : > { %v545_v44 = vpop.permute.xlu0 %544 }
 0x1a9   : > { %v560_v53 = vpop.permute.xlu1 %559 }
 0x1aa   : > { %v555_v56 = vpop.permute.xlu0 %554 }
 0x1ad   : > { %v720_v6 = vpop.permute.xlu1 %719 }
 0x1ae   : > { %v715_v7 = vpop.permute.xlu0 %714 }
 0x1b1   : > { %v730_v8 = vpop.permute.xlu1 %729 }
 0x1b2   : > { %v725_v9 = vpop.permute.xlu0 %724 }
 0x1b5   : > { %v850_v13 = vpop.permute.xlu1 %849 }
 0x1b6   : > { %v845_v17 = vpop.permute.xlu0 %844 }
 0x1b9   : > { %v860_v26 = vpop.permute.xlu1 %859 }
 0x1f2   : > { %v1303_v32 = vpop.f32.mrb[0].mxu0 }
 0x1f3   : > { %v663_v33 = vadd.f32 %v1303_v32, %v530_v31  ;;  %v657_v34 = vpop.f32.mrb[1].mxu0 }
 0x1f4   : > { %v658_v35 = vadd.f32 %v657_v34, %v525_v29 }
 0x1f5   : > { %v697_v36 = vmax.f32 %v663_v33, 0.0  ;;  %v855_v33 = vpop.permute.xlu0 %854 }
 0x1f6   : > { %v696_v37 = vmax.f32 %v658_v35, 0.0  ;;  %v1306_v38 = vpop.f32.mrb[2].mxu0 }
 0x1f7   : > { %v673_v39 = vadd.f32 %v1306_v38, %v540_v30  ;;  %v667_v40 = vpop.f32.mrb[3].mxu0 }
 0x1f8   : > { %v668_v42 = vadd.f32 %v667_v40, %v535_v28  ;;  %v1341_v43 = vpack.c.bf16 %v697_v36, %v696_v37 }
 0x1f9   : > { %v699_v45 = vmax.f32 %v673_v39, 0.0 }
 0x1fa   : > { %v698_v46 = vmax.f32 %v668_v42, 0.0  ;;  %v1309_v47 = vpop.f32.mrb[4].mxu0  ;;  %1342 = vmatprep.subr.bf16.mxu1 %v1341_v43 }
 0x1fb   : > { %v683_v48 = vadd.f32 %v1309_v47, %v550_v41  ;;  %v677_v49 = vpop.f32.mrb[5].mxu0  ;;  %1344 = vmatpush3.bf16.msra.mxu1 %v1341_v43 }
 0x1fc   : > { %v1345_v50 = vpack.c.bf16 %v699_v45, %v698_v46  ;;  %v678_v51 = vadd.f32 %v677_v49, %v545_v44 }
 0x1fd   : > { %v701_v52 = vmax.f32 %v683_v48, 0.0 }
 0x1fe   : > { %v700_v54 = vmax.f32 %v678_v51, 0.0  ;;  %v1312_v55 = vpop.f32.mrb[6].mxu0  ;;  %1346 = vmatprep.subr.bf16.mxu1 %v1345_v50 }
 0x1ff   : > { %v693_v57 = vadd.f32 %v1312_v55, %v560_v53  ;;  %v687_v58 = vpop.f32.mrb[7].mxu0  ;;  %1348 = vmatpush3.bf16.msra.mxu1 %v1345_v50 }
 0x200   : > { %v1349_v60 = vpack.c.bf16 %v701_v52, %v700_v54  ;;  %v688_v61 = vadd.f32 %v687_v58, %v555_v56 }
 0x201   : > { %v703_v62 = vmax.f32 %v693_v57, 0.0 }
 0x202   : > { %v702_v0 = vmax.f32 %v688_v61, 0.0  ;;  %1322 = vmatmul.mubr.msk.f32.vlgmr.msra.gmra.mrb[0].mxu1 %vm732_vm2, %v705_v59  ;;  %1350 = vmatprep.subr.bf16.mxu0 %v1349_v60 }
 0x203   : > { %1357 = vmatprep.subr.bf16.mxu1 %v1349_v60  ;;  %1352 = vmatpush3.bf16.msra.mxu0 %v1349_v60 }
 0x204   : > { %v1353_v2 = vpack.c.bf16 %v703_v62, %v702_v0  ;;  %1359 = vmatpush3.bf16.msra.mxu1 %v1349_v60  ;;  %1324 = vmatprep.mubr.msk.f32.mxu1 %vm732_vm2, %v706_v63 }
 0x206   : > { %1325 = vmatmul.mubr.msk.f32.gmra.mrb[2].mxu1 %vm732_vm2, %v707_v1  ;;  %1354 = vmatprep.subr.bf16.mxu0 %v1353_v2 }
 0x207   : > { %1358 = vmatprep.subr.bf16.mxu1 %v1353_v2  ;;  %1356 = vmatpush3.bf16.msra.mxu0 %v1353_v2 }
 0x208   : > { %1360 = vmatpush3.bf16.msra.mxu1 %v1353_v2  ;;  %1338 = vmatprep.mubr.msk.f32.mxu1 %vm732_vm2, %v836_v3 }
 0x20a   : > { %1336 = vmatmul.mubr.msk.f32.vlgmr.msra.gmra.mrb[8].mxu0 %vm732_vm2, %v835_v4 }
 0x20b   : > { %1339 = vmatmul.mubr.msk.f32.vlgmr.msra.gmra.mrb[4].mxu1 %vm732_vm2, %v837_v5 }
 0x2d5   : > { %v1323_v10 = vpop.f32.mrb[0].mxu1 }
 0x2d6   : > { %v817_v11 = vadd.f32 %v1323_v10, %v720_v6  ;;  %v811_v12 = vpop.f32.mrb[1].mxu1 }
 0x2d7   : > { %v812_v15 = vadd.f32 %v811_v12, %v715_v7 }
 0x2d8   : > { %v831_v16 = vmax.f32 %v817_v11, 0.0 }
 0x2d9   : > { %v830_v18 = vmax.f32 %v812_v15, 0.0  ;;  %v1326_v19 = vpop.f32.mrb[2].mxu1 }
 0x2da   : > { %v970_v20 = vmul.f32 %v2334_v14, %v831_v16  ;;  %v827_v21 = vadd.f32 %v1326_v19, %v730_v8  ;;  %v821_v22 = vpop.f32.mrb[3].mxu1 }
 0x2db   : > { %v969_v23 = vmul.f32 %v2334_v14, %v830_v18  ;;  %v822_v24 = vadd.f32 %v821_v22, %v725_v9 }
 0x2dc   : > { %974 = vst [vmem:[%s2341_s5 + $0x8] sm:$0xff] %v970_v20  ;;  %v833_v25 = vmax.f32 %v827_v21, 0.0 }
 0x2dd   : > { %973 = vst [vmem:[%s2341_s5] sm:$0xff] %v969_v23  ;;  %v832_v27 = vmax.f32 %v822_v24, 0.0  ;;  %v1337_v28 = vpop.f32.mrb[8].mxu0 }
 0x2de   : > { %v972_v29 = vmul.f32 %v2334_v14, %v833_v25  ;;  %v946_v30 = vadd.f32 %v1337_v28, %v850_v13  ;;  %v1340_v31 = vpop.f32.mrb[4].mxu1  ;;  %v940_v32 = vpop.f32.mrb[9].mxu0 }
 0x2df   : > { %v971_v34 = vmul.f32 %v2334_v14, %v832_v27  ;;  %v956_v35 = vadd.f32 %v1340_v31, %v860_v26  ;;  %v941_v36 = vadd.f32 %v940_v32, %v845_v17  ;;  %v950_v37 = vpop.f32.mrb[5].mxu1 }
 0x2e0   : > { %976 = vst [vmem:[%s2341_s5 + $0x18] sm:$0xff] %v972_v29  ;;  %v960_v38 = vmax.f32 %v946_v30, 0.0  ;;  %v951_v39 = vadd.f32 %v950_v37, %v855_v33 }
 0x2e1   : > { %975 = vst [vmem:[%s2341_s5 + $0x10] sm:$0xff] %v971_v34  ;;  %v962_v40 = vmax.f32 %v956_v35, 0.0  ;;  %v959_v41 = vmax.f32 %v941_v36, 0.0 }
 0x2e2   : > { %v978_v42 = vmul.f32 %v2334_v14, %v960_v38  ;;  %v961_v43 = vmax.f32 %v951_v39, 0.0 }
 0x2e3   : > { %1759 = shalt.err (!%p1756_p4)
}
 0x2e4   : > { %s1760_s27 = scalar_lea.hbm %s2357_s13, 512  ;;  %s1764_s28 = scalar_lea.hbm %s2520_s4, 2048 }
 0x2e5   : > { %p1761_p10 = scmp.ne.s32.totalorder %s2357_s13, %s1760_s27  ;;  %p1765_p5 = scmp.lt.u32.totalorder %s2357_s13, %s2520_s4 }
 0x2e6   : > { %p1766_p3 = scmp.lt.u32.totalorder %s1764_s28, %s1760_s27  ;;  %p1768_p7 = scmp.lt.u32.totalorder %s1760_s27, %s2357_s13 }
 0x2e7   : > { %p1762_p6 = pnand %p1761_p10, %p2521_p9 }
 0x2e8   : > { %p1767_p2 = por %p1766_p3, %p1765_p5 }
 0x2e9   : > { %p1763_p8 = pneg %p1762_p6 }
 0x2ea   : > { %p1769_p1 = por %p1768_p7, %p1767_p2 }
 0x2ec   : > { %p1770_p11 = pnand %p1769_p1, %p1763_p8 }
 0x2ee   : > { %1773 = shalt.err (!%p1770_p11)
}
 0x2ef   : > { %s2487_s24 = smov 128   ;;  %s1907_s9 = smov 256   ;;  %v980_v44 = vmul.f32 %v2334_v14, %v962_v40  ;;  %v977_v45 = vmul.f32 %v2334_v14, %v959_v41  ;;  %982 = vst [vmem:[%s2363_s2 + $0x8] sm:$0xff] %v978_v42  ;;  %v979_v46 = vmul.f32 %v2334_v14, %v961_v43 }
 0x2f0   : > { %s1908_s5 = smov 8   ;;  %s2522_s28 = sld [smem:[#allocation35_spill]] }
 0x2f1   : > { %1389 = dma.vmem_to_hbm [thread:$0]  (%p2521_p9), %s2348_s3, 512, %s2357_s13, %s986_s1, %s2487_s24, %s1907_s9, %s1908_s5  }
 0x2f2   : > { %984 = vst [vmem:[%s2363_s2 + $0x18] sm:$0xff] %v980_v44  ;;  %981 = vst [vmem:[%s2363_s2] sm:$0xff] %v977_v45  ;;  %s991_s3 = scalar_lea.sflag [#allocation18], %s2288_s12  ;;  %s1774_s13 = scalar_lea.vmem %s2397_s23, 512 }
 0x2f3   : > { %983 = vst [vmem:[%s2363_s2 + $0x10] sm:$0xff] %v979_v46  ;;  %p1775_p12 = scmp.ne.s32.totalorder %s2397_s23, %s1774_s13  ;;  %s1909_s1 = smov [#allocation17]  }
 0x2f4   : > { %s1778_s8 = sshll.u32 %s1909_s1, 4  ;;  %s1779_s8 = int_to_ptr.vmem [resolvable:$false] %s1778_s8 }
 0x2f5   : > { %p1776_p13 = pnand %p1775_p12, %p2521_p9  ;;  %s1780_s24 = scalar_lea.vmem %s1779_s8, 1024 }
 0x2f6   : > { %s2408_s18 = scalar_lea.hbm %s2522_s28, %s1269_s17  ;;  %p1781_p4 = scmp.lt.s32.totalorder %s2397_s23, %s1779_s8 }
 0x2f7   : > { %p1777_p0 = pneg %p1776_p13  ;;  %p1782_p10 = scmp.lt.s32.totalorder %s1780_s24, %s1774_s13 }
 0x2f9   : > { %p1783_p6 = por %p1782_p10, %p1781_p4 }
 0x2fb   : > { %p1784_p8 = pnand %p1783_p6, %p1777_p0 }
 0x2fd   : > { %1787 = shalt.err (!%p1784_p8)
}
 0x2fe   : > { %s1788_s21 = scalar_lea.hbm %s2408_s18, 512  ;;  %s1792_s27 = scalar_lea.hbm %s2522_s28, 2048 }
 0x2ff   : > { %p1789_p5 = scmp.ne.s32.totalorder %s2408_s18, %s1788_s21  ;;  %p1793_p7 = scmp.lt.u32.totalorder %s2408_s18, %s2522_s28 }
 0x300   : > { %p1794_p1 = scmp.lt.u32.totalorder %s1792_s27, %s1788_s21  ;;  %p1796_p12 = scmp.lt.u32.totalorder %s1788_s21, %s2408_s18 }
 0x301   : > { %p1790_p3 = pnand %p1789_p5, %p2521_p9 }
 0x302   : > { %p1795_p11 = por %p1794_p1, %p1793_p7 }
 0x303   : > { %p1791_p2 = pneg %p1790_p3 }
 0x304   : > { %p1797_p13 = por %p1796_p12, %p1795_p11 }
 0x306   : > { %p1798_p0 = pnand %p1797_p13, %p1791_p2 }
 0x308   : > { %1801 = shalt.err (!%p1798_p0)
}
 0x309   : > { %s2523_s24 = smov 128  }
 0x30a   : > { %1390 = dma.vmem_to_hbm [thread:$0]  (%p2521_p9), %s2397_s23, 512, %s2408_s18, %s991_s3, %s2523_s24, %s1907_s9, %s1908_s5  }
 0x30b PF: > { %p1439_p4 = scmp.ge.s32.totalorder %s1892_s16, 2  ;;  %s1037_s13 = sand.u32 1, %s1864_s30  }
 0x30c   : > { %p2524_p10 = scmp.ne.s32.totalorder %s2512_s25, 0  ;;  %s1038_s8 = scalar_lea.sflag [#allocation4], %s1037_s13 }
 0x30e   : > { %p1420_p6 = pnand %p1439_p4, %p2524_p10 }
 0x310   : > { %1855 = dma.done.wait (!%p1420_p6), %s1038_s8, 512  }
 0x311   : > { %1857 = vsyncadd (!%p1420_p6), %s1038_s8, 4294966784  ;;  %s1047_s19 = scalar_lea.sflag [#allocation18], %s1037_s13 }
 0x312   : > { %1859 = dma.done.wait (!%p1420_p6), %s1047_s19, 512  }
 0x313   : > { %1861 = vsyncadd (!%p1420_p6), %s1047_s19, 4294966784  ;;  %s35_s16 = sadd.s32 1, %s1892_s16   ;;  %s2525_s30 = smov %s1868_s10 }
 0x314   : > { %p32_p8 = scmp.ge.s32.totalorder %s35_s16, 6   ;;  %s2526_s10 = smov %s1872_s11 }
 0x315   : > { %s2527_s11 = smov %s2214_s29  ;;  %s2528_s12 = smov %s1884_s14 }
 0x316   : > { %s2529_s13 = smov %s1888_s15  ;;  %s2530_s14 = smov %s2533_s22 }
 0x317   : > { %s2531_s15 = smov %s2537_s26  ;;  %34 = sbr.rel (!%p32_p8) target bundleno = 22 (0x16), region = 151 }
 0x31e   :  { %1052 = vsyncpa [#allocation3], 1 }
 0x31f   :  { %1054 = vsyncpa [#allocation3 + $0x1], 1 }
 0x320   :  { %1055 = vsyncpa [#allocation6], 1 }
 0x321   :  { %1056 = vsyncpa [#allocation9], 1 }
 0x322   :  { %1057 = vsyncpa [#allocation12], 1 }
 0x323   :  { %1058 = vsyncpa [#allocation15], 1 }
 0x324   :  { %1060 = vsyncpa [#allocation15 + $0x1], 1 }
 0x325   :  { %1061 = vsyncpa [#allocation4], 1 }
 0x326   :  { %1063 = vsyncpa [#allocation4 + $0x1], 1 }
 0x327   :  { %1064 = vsyncpa [#allocation18], 1 }
 0x328   :  { %1066 = vsyncpa [#allocation18 + $0x1], 1 }

// kernel: regular_block_forward.5
= control target key start
LH: loop header
LB: loop body
LE: loop exit
PB: predicated region body
PF: predicated region fallthrough
CT: control target
= control target key end

     0   :  { %s1808_s0 = inlined_call_operand.hbm [shape: f32[2,4,256], index: 0, kind: input, shape index: {}]   ;;  %s1809_s1 = inlined_call_operand.hbm [shape: f32[2,32,256], index: 1, kind: input, shape index: {}]   ;;  %s1810_s2 = inlined_call_operand.hbm [shape: f32[32,4], index: 2, kind: input, shape index: {}]   ;;  %s1811_s3 = inlined_call_operand.hbm [shape: f32[32,32], index: 3, kind: input, shape index: {}]   ;;  %s1812_s4 = inlined_call_operand.hbm [shape: f32[32,1], index: 4, kind: input, shape index: {}]   ;;  %s1813_s5 = inlined_call_operand.hbm [shape: f32[2,1,256], index: 5, kind: input, shape index: {}]   ;;  %s1814_s6 = inlined_call_operand.hbm [shape: f32[2,32,256], index: 6, kind: output, shape index: {}]  }
   0x1   :  { %1827 = sst [smem:[#allocation25_spill]] %s1808_s0 }
   0x2   :  { %1828 = sst [smem:[#allocation26_spill]] %s1810_s2 }
   0x3   :  { %1829 = sst [smem:[#allocation27_spill]] %s1811_s3 }
   0x4   :  { %1830 = sst [smem:[#allocation28_spill]] %s1812_s4 }
   0x5   :  { %1831 = sst [smem:[#allocation29_spill]] %s1814_s6 }
   0x6   :  { %11 = vsyncpa [#allocation3], 0 }
   0x7   :  { %13 = vsyncpa [#allocation3 + $0x1], 0 }
   0x8   :  { %14 = vsyncpa [#allocation6], 0 }
   0x9   :  { %16 = vsyncpa [#allocation6 + $0x1], 0 }
   0xa   :  { %17 = vsyncpa [#allocation9], 0 }
   0xb   :  { %18 = vsyncpa [#allocation12], 0 }
   0xc   :  { %20 = vsyncpa [#allocation12 + $0x1], 0 }
   0xd   :  { %21 = vsyncpa [#allocation4], 0 }
   0xe   :  { %23 = vsyncpa [#allocation4 + $0x1], 0  ;;  %s1394_s21 = smov 0   ;;  %s1396_s22 = smov 0  }
   0xf   :  { %s1398_s23 = smov 0   ;;  %s1400_s24 = smov 0  }
  0x10   :  { %s1402_s25 = smov 0   ;;  %s1404_s26 = smov 0  }
  0x11   :  { %s1406_s27 = smov 0   ;;  %s1408_s28 = smov 0  }
  0x12 LB: > { %1832 = sst [smem:[#allocation20_spill]] %s1315_s21  ;;  %s1435_s29 = sadd.s32 4294967295, %s1343_s28   ;;  %s1343_s28 = sphi %s1408_s28, %s29_s28   ;;  %s1339_s27 = sphi %s1406_s27, %s1875_s27   ;;  %s1335_s26 = sphi %s1404_s26, %s1874_s26   ;;  %s1331_s25 = sphi %s1402_s25, %s1873_s25   ;;  %s1327_s24 = sphi %s1400_s24, %s1872_s24   ;;  %s1323_s23 = sphi %s1398_s23, %s1871_s23   ;;  %s1319_s22 = sphi %s1396_s22, %s1870_s22   ;;  %s1315_s21 = sphi %s1394_s21, %s1869_s21  }
  0x13   : > { %1833 = sst [smem:[#allocation21_spill]] %s1327_s24  ;;  %s844_s30 = sadd.s32 4294967294, %s1343_s28  }
  0x14   : > { %p63_p0 = scmp.ne.s32.totalorder %s1319_s22, %s1315_s21  ;;  %p1815_p1 = scmp.eq.s32.totalorder %s1435_s29, 0 }
  0x15   : > { %p214_p3 = scmp.eq.s32.totalorder %s844_s30, 3  ;;  %p845_p5 = scmp.ge.s32.totalorder %s1343_s28, 1 }
  0x16   : > { %p1444_p4 = por %p1815_p1, %p63_p0  ;;  %p221_p7 = scmp.lt.s32.totalorder %s1343_s28, 5 }
  0x17   : > { %p1449_p6 = por %p214_p3, %p63_p0  ;;  %s1345_s10 = smov [#allocation7]  }
  0x18   : > { %s1834_s7 = scalar_select %p1444_p4, 1, 0 }
  0x19   : > { %s1835_s8 = scalar_select %p1449_p6, 1, 0 }
  0x1a   : > { %p1454_p8 = pnand %p845_p5, %p221_p7  ;;  %s233_s11 = sshll.u32 %s1345_s10, 4  ;;  %s1458_s11 = int_to_ptr.vmem [resolvable:$true] %s233_s11 }
  0x1b   : > { %1836 = sst [smem:[#allocation22_spill]] %s1835_s8  ;;  %s1346_s13 = smov [#allocation8]  }
  0x1c   : > { %s1837_s9 = scalar_select %p1454_p8, 1, 0 }
  0x1d   : > { %p947_p9 = pneg %p1454_p8  ;;  %s246_s14 = sshll.u32 %s1346_s13, 4  ;;  %s1468_s14 = int_to_ptr.vmem [resolvable:$true] %s246_s14 }
  0x1e   : > { %s1347_s15 = smov [#allocation10]   ;;  %s1839_s2 = sld [smem:[#allocation26_spill]] }
  0x1f   : > { %p1464_p10 = pnand %p947_p9, %p1815_p1  ;;  %s1470_s16 = sshll.u32 %s1347_s15, 4  ;;  %s260_s16 = int_to_ptr.vmem [resolvable:$true] %s1470_s16 }
  0x21   : > { %p1480_p12 = pneg %p1464_p10 }
  0x24   : > { %s1055_s19 = scalar_lea.hbm %s1839_s2, 512 }
  0x25   : > { %p1056_p11 = scmp.ne.s32.totalorder %s1839_s2, %s1055_s19  ;;  %p1062_p3 = scmp.lt.u32.totalorder %s1055_s19, %s1839_s2 }
  0x27   : > { %p1058_p13 = pnand %p1480_p12, %p1056_p11 }
  0x29   : > { %p1059_p0 = pneg %p1058_p13 }
  0x2b   : > { %p1064_p5 = pnand %p1062_p3, %p1059_p0 }
  0x2d   : > { %1067 = shalt.err (!%p1064_p5)
}
  0x2e   : > { %s1068_s17 = scalar_lea.vmem %s1458_s11, 512  ;;  %p1076_p2 = scmp.lt.s32.totalorder %s1458_s11, %s1458_s11 }
  0x2f   : > { %p1069_p7 = scmp.ne.s32.totalorder %s1458_s11, %s1068_s17  ;;  %p1077_p6 = scmp.lt.s32.totalorder %s1068_s17, %s1068_s17 }
  0x31   : > { %p1071_p9 = pnand %p1069_p7, %p1480_p12  ;;  %p1078_p11 = por %p1077_p6, %p1076_p2 }
  0x33   : > { %p1072_p1 = pneg %p1071_p9 }
  0x35   : > { %p1079_p13 = pnand %p1078_p11, %p1072_p1 }
  0x37   : > { %1082 = shalt.err (!%p1079_p13)
}
  0x38   : > { %s1821_s18 = smov 128   ;;  %s1822_s19 = smov 8  }
  0x39   : > { %950 = dma.hbm_to_vmem [thread:$0]  (!%p1464_p10), %s1839_s2, 512, %s1458_s11, [#allocation6], %s1821_s18, %s1821_s18, %s1822_s19  }
  0x3a   : > { %s1841_s3 = sld [smem:[#allocation27_spill]] }
  0x40   : > { %s1083_s17 = scalar_lea.hbm %s1841_s3, 512 }
  0x41   : > { %p1084_p1 = scmp.ne.s32.totalorder %s1841_s3, %s1083_s17  ;;  %p1090_p0 = scmp.lt.u32.totalorder %s1083_s17, %s1841_s3 }
  0x43   : > { %p1086_p2 = pnand %p1084_p1, %p1480_p12 }
  0x45   : > { %p1087_p6 = pneg %p1086_p2 }
  0x47   : > { %p1092_p3 = pnand %p1090_p0, %p1087_p6 }
  0x49   : > { %1095 = shalt.err (!%p1092_p3)
}
  0x4a   : > { %s1096_s11 = scalar_lea.vmem %s1468_s14, 512  ;;  %p1104_p11 = scmp.lt.s32.totalorder %s1468_s14, %s1468_s14 }
  0x4b   : > { %p1097_p5 = scmp.ne.s32.totalorder %s1468_s14, %s1096_s11  ;;  %p1105_p13 = scmp.lt.s32.totalorder %s1096_s11, %s1096_s11 }
  0x4d   : > { %p1099_p7 = pnand %p1097_p5, %p1480_p12  ;;  %p1106_p1 = por %p1105_p13, %p1104_p11 }
  0x4f   : > { %p1100_p9 = pneg %p1099_p7 }
  0x51   : > { %p1107_p2 = pnand %p1106_p1, %p1100_p9 }
  0x53   : > { %1110 = shalt.err (!%p1107_p2)
}
  0x54   : > { %953 = dma.hbm_to_vmem [thread:$0]  (!%p1464_p10), %s1841_s3, 512, %s1468_s14, [#allocation9], %s1821_s18, %s1821_s18, %s1822_s19  }
  0x55   : > { %s1842_s4 = sld [smem:[#allocation28_spill]] }
  0x5b   : > { %s1111_s20 = scalar_lea.hbm %s1842_s4, 512 }
  0x5c   : > { %p1112_p6 = scmp.ne.s32.totalorder %s1842_s4, %s1111_s20  ;;  %p1118_p5 = scmp.lt.u32.totalorder %s1111_s20, %s1842_s4 }
  0x5e   : > { %p1114_p0 = pnand %p1112_p6, %p1480_p12 }
  0x60   : > { %p1115_p3 = pneg %p1114_p0 }
  0x62   : > { %p1120_p7 = pnand %p1118_p5, %p1115_p3 }
  0x64   : > { %1123 = shalt.err (!%p1120_p7)
}
  0x65   : > { %s1124_s11 = scalar_lea.vmem %s260_s16, 512  ;;  %p1132_p1 = scmp.lt.s32.totalorder %s260_s16, %s260_s16 }
  0x66   : > { %p1125_p9 = scmp.ne.s32.totalorder %s260_s16, %s1124_s11  ;;  %p1133_p2 = scmp.lt.s32.totalorder %s1124_s11, %s1124_s11 }
  0x68   : > { %p1127_p11 = pnand %p1125_p9, %p1480_p12  ;;  %p1134_p4 = por %p1133_p2, %p1132_p1 }
  0x6a   : > { %p1128_p13 = pneg %p1127_p11 }
  0x6c   : > { %p1135_p8 = pnand %p1134_p4, %p1128_p13 }
  0x6e   : > { %1138 = shalt.err (!%p1135_p8)
}
  0x6f   : > { %956 = dma.hbm_to_vmem [thread:$0]  (!%p1464_p10), %s1842_s4, 512, %s260_s16, [#allocation9], %s1821_s18, %s1821_s18, %s1822_s19  }
  0x70   : > { %s38_s12 = sadd.s32 1, %s1335_s26  ;;  %s41_s10 = sadd.s32 1, %s1339_s27 }
  0x71   : > { %p39_p4 = scmp.ge.s32.totalorder %s38_s12, 2  ;;  %s50_s21 = sadd.s32 1, %s1323_s23 }
  0x72   : > { %p57_p8 = scmp.ne.s32.totalorder %s1323_s23, %s1319_s22  ;;  %p58_p12 = scmp.eq.s32.totalorder %s1343_s28, 0 }
  0x73   : > { %s1877_s12 = smov (%p39_p4, %s38_s12), 0  ;;  %s1879_s10 = smov (!%p39_p4, %s41_s10), %s1339_s27 }
  0x74   : > { %1843 = sst [smem:[#allocation23_spill]] %s1877_s12  ;;  %s46_s24 = ssub.s32 %s1335_s26, %s1877_s12 }
  0x75   : > { %p43_p6 = scmp.ge.s32.totalorder %s1879_s10, 2  ;;  %p1844_p0 = scmp.eq.s32.totalorder %s1435_s29, 3 }
  0x76   : > { %p1569_p10 = por %p58_p12, %p57_p8  ;;  %p974_p5 = scmp.lt.s32.totalorder %s1343_s28, 4 }
  0x77   : > { %p1565_p3 = por %p1844_p0, %p57_p8  ;;  %s1881_s10 = smov (%p43_p6, %s1879_s10), 0 }
  0x78   : > { %1847 = sst [smem:[#allocation24_spill]] %s1881_s10  ;;  %s1577_s20 = sand.u32 1, %s1323_s23  }
  0x79   : > { %s1845_s8 = scalar_select %p1565_p3, 1, 0 }
  0x7a   : > { %s851_s30 = sshll.u32 %s1339_s27, 1  ;;  %s45_s13 = ssub.s32 %s1339_s27, %s1881_s10 }
  0x7b   : > { %s47_s15 = sor.u32 %s46_s24, %s45_s13  ;;  %s850_s17 = sshll.u32 %s1577_s20, 2 }
  0x7c   : > { %p48_p7 = scmp.eq.s32.totalorder %s47_s15, 0  ;;  %s1584_s11 = sadd.s32 %s1335_s26, %s851_s30 }
  0x7d   : > { %s277_s14 = scalar_lea.vmem [#allocation2], %s850_s17  ;;  %s852_s19 = sshll.u32 %s1584_s11, 6 }
  0x7e   : > { %s286_s6 = sshll.u32 %s277_s14, 4  ;;  %s1848_s0 = sld [smem:[#allocation25_spill]]  ;;  %s1590_s6 = int_to_ptr.vmem [resolvable:$true] %s286_s6 }
  0x7f   : > { %s1587_s18 = scalar_select %p48_p7, %s1323_s23, %s50_s21  }
  0x80   : > { %p1601_p9 = pnand %p974_p5, %p1569_p10  ;;  %s854_s30 = sshll.u32 %s1339_s27, 3 }
  0x81   : > { %s1608_s13 = sadd.s32 %s1335_s26, %s854_s30  ;;  %s274_s15 = scalar_lea.sflag [#allocation3], %s1577_s20 }
  0x82   : > { %s1849_s24 = scalar_select %p1601_p9, 1, 0 }
  0x83   : > { %p1615_p13 = pneg %p1601_p9 }
  0x84   : > { %s1595_s4 = scalar_lea.hbm %s1848_s0, %s852_s19  ;;  %s1144_s16 = scalar_lea.hbm %s1848_s0, 256 }
  0x85   : > { %s1139_s17 = scalar_lea.hbm %s1595_s4, 64  ;;  %p1145_p4 = scmp.lt.u32.totalorder %s1595_s4, %s1848_s0 }
  0x86   : > { %p1140_p11 = scmp.ne.s32.totalorder %s1595_s4, %s1139_s17  ;;  %p1146_p8 = scmp.lt.u32.totalorder %s1144_s16, %s1139_s17 }
  0x87   : > { %p1148_p6 = scmp.lt.u32.totalorder %s1139_s17, %s1595_s4 }
  0x88   : > { %p1142_p1 = pnand %p1615_p13, %p1140_p11  ;;  %p1147_p12 = por %p1146_p8, %p1145_p4 }
  0x8a   : > { %p1143_p2 = pneg %p1142_p1  ;;  %p1149_p0 = por %p1148_p6, %p1147_p12 }
  0x8c   : > { %p1150_p10 = pnand %p1149_p0, %p1143_p2 }
  0x8e   : > { %1153 = shalt.err (!%p1150_p10)
}
  0x8f   : > { %s1154_s30 = scalar_lea.vmem %s1590_s6, 64  ;;  %s1350_s3 = smov [#allocation2]  }
  0x90   : > { %p1155_p5 = scmp.ne.s32.totalorder %s1590_s6, %s1154_s30  ;;  %s1159_s19 = sshll.u32 %s1350_s3, 4  ;;  %s1160_s19 = int_to_ptr.vmem [resolvable:$false] %s1159_s19 }
  0x91   : > { %s1161_s21 = scalar_lea.vmem %s1160_s19, 128  ;;  %p1162_p1 = scmp.lt.s32.totalorder %s1590_s6, %s1160_s19 }
  0x92   : > { %p1157_p7 = pnand %p1155_p5, %p1615_p13  ;;  %p1163_p3 = scmp.lt.s32.totalorder %s1161_s21, %s1154_s30 }
  0x94   : > { %p1158_p11 = pneg %p1157_p7  ;;  %p1164_p4 = por %p1163_p3, %p1162_p1 }
  0x96   : > { %p1165_p8 = pnand %p1164_p4, %p1158_p11 }
  0x98   : > { %1168 = shalt.err (!%p1165_p8)
}
  0x99   : > { %960 = dma.hbm_to_vmem [thread:$0]  (!%p1601_p9), %s1595_s4, 64, %s1590_s6, %s274_s15  }
  0x9a   : > { %s855_s17 = sshll.u32 %s1608_s13, 7  ;;  %s293_s16 = sand.u32 1, %s1343_s28  }
  0x9b   : > { %s1643_s0 = scalar_lea.hbm %s1809_s1, %s855_s17  ;;  %s1851_s30 = sshll.u32 %s1577_s20, 5 }
  0x9c   : > { %s297_s19 = scalar_lea.vmem [#allocation5], %s1851_s30  ;;  %s1649_s10 = scalar_lea.sflag [#allocation6], %s293_s16 }
  0x9d   : > { %s305_s21 = sshll.u32 %s297_s19, 4  ;;  %s1169_s12 = scalar_lea.hbm %s1643_s0, 512  ;;  %s1647_s21 = int_to_ptr.vmem [resolvable:$true] %s305_s21 }
  0x9e   : > { %p1170_p3 = scmp.ne.s32.totalorder %s1643_s0, %s1169_s12  ;;  %s1174_s13 = scalar_lea.hbm %s1809_s1, 2048 }
  0x9f   : > { %p1175_p6 = scmp.lt.u32.totalorder %s1643_s0, %s1809_s1  ;;  %p1176_p0 = scmp.lt.u32.totalorder %s1174_s13, %s1169_s12 }
  0xa0   : > { %p1172_p2 = pnand %p1170_p3, %p1615_p13  ;;  %p1178_p5 = scmp.lt.u32.totalorder %s1169_s12, %s1643_s0 }
  0xa1   : > { %p1177_p10 = por %p1176_p0, %p1175_p6 }
  0xa2   : > { %p1173_p12 = pneg %p1172_p2 }
  0xa3   : > { %p1179_p7 = por %p1178_p5, %p1177_p10 }
  0xa5   : > { %p1180_p11 = pnand %p1179_p7, %p1173_p12 }
  0xa7   : > { %1183 = shalt.err (!%p1180_p11)
}
  0xa8   : > { %s1184_s16 = scalar_lea.vmem %s1647_s21, 512  ;;  %s1351_s14 = smov [#allocation5]  }
  0xa9   : > { %p1185_p1 = scmp.ne.s32.totalorder %s1647_s21, %s1184_s16  ;;  %s1189_s3 = sshll.u32 %s1351_s14, 4  ;;  %s1190_s3 = int_to_ptr.vmem [resolvable:$false] %s1189_s3 }
  0xaa   : > { %s1191_s30 = scalar_lea.vmem %s1190_s3, 1024  ;;  %p1192_p3 = scmp.lt.s32.totalorder %s1647_s21, %s1190_s3 }
  0xab   : > { %p1187_p4 = pnand %p1185_p1, %p1615_p13  ;;  %p1193_p2 = scmp.lt.s32.totalorder %s1191_s30, %s1184_s16 }
  0xad   : > { %p1188_p8 = pneg %p1187_p4  ;;  %p1194_p6 = por %p1193_p2, %p1192_p3 }
  0xaf   : > { %p1195_p0 = pnand %p1194_p6, %p1188_p8 }
  0xb1   : > { %1198 = shalt.err (!%p1195_p0)
}
  0xb2   : > { %s1352_s12 = smov 256   ;;  %s1852_s19 = smov 8  }
  0xb3   : > { %s1853_s4 = smov 128   ;;  %s857_s6 = sshll.u32 %s1584_s11, 4 }
  0xb4   : > { %963 = dma.hbm_to_vmem [thread:$0]  (!%p1601_p9), %s1643_s0, 512, %s1647_s21, %s1649_s10, %s1352_s12, %s1853_s4, %s1852_s19  }
  0xb5   : > { %s318_s13 = scalar_lea.vmem [#allocation11], %s1577_s20  ;;  %s1680_s14 = scalar_lea.hbm %s1813_s5, %s857_s6 }
  0xb6   : > { %s327_s15 = sshll.u32 %s318_s13, 4  ;;  %s316_s3 = scalar_lea.sflag [#allocation12], %s1577_s20  ;;  %s328_s15 = int_to_ptr.vmem [resolvable:$true] %s327_s15 }
  0xb7   : > { %s1199_s30 = scalar_lea.hbm %s1680_s14, 16  ;;  %s1204_s11 = scalar_lea.hbm %s1813_s5, 64 }
  0xb8   : > { %p1200_p12 = scmp.ne.s32.totalorder %s1680_s14, %s1199_s30  ;;  %p1205_p7 = scmp.lt.u32.totalorder %s1680_s14, %s1813_s5 }
  0xb9   : > { %p1206_p11 = scmp.lt.u32.totalorder %s1204_s11, %s1199_s30  ;;  %p1208_p4 = scmp.lt.u32.totalorder %s1199_s30, %s1680_s14 }
  0xba   : > { %p1202_p10 = pnand %p1200_p12, %p1615_p13 }
  0xbb   : > { %p1207_p1 = por %p1206_p11, %p1205_p7 }
  0xbc   : > { %p1203_p5 = pneg %p1202_p10 }
  0xbd   : > { %p1209_p8 = por %p1208_p4, %p1207_p1 }
  0xbf   : > { %p1210_p3 = pnand %p1209_p8, %p1203_p5 }
  0xc1   : > { %1213 = shalt.err (!%p1210_p3)
}
  0xc2   : > { %s1214_s20 = scalar_lea.vmem %s328_s15, 16  ;;  %s1353_s19 = smov [#allocation11]  }
  0xc3   : > { %p1215_p2 = scmp.ne.s32.totalorder %s328_s15, %s1214_s20  ;;  %s1219_s4 = sshll.u32 %s1353_s19, 4  ;;  %s1220_s4 = int_to_ptr.vmem [resolvable:$false] %s1219_s4 }
  0xc4   : > { %s1221_s6 = scalar_lea.vmem %s1220_s4, 32  ;;  %p1222_p12 = scmp.lt.s32.totalorder %s328_s15, %s1220_s4 }
  0xc5   : > { %p1217_p6 = pnand %p1215_p2, %p1615_p13  ;;  %p1223_p10 = scmp.lt.s32.totalorder %s1221_s6, %s1214_s20 }
  0xc7   : > { %p1218_p0 = pneg %p1217_p6  ;;  %p1224_p9 = por %p1223_p10, %p1222_p12 }
  0xc9   : > { %p1225_p7 = pnand %p1224_p9, %p1218_p0 }
  0xcb   : > { %1228 = shalt.err (!%p1225_p7)
}
  0xcc   : > { %p1854_p11 = scmp.ne.s32.totalorder %s1849_s24, 0  ;;  %p1855_p5 = scmp.ne.s32.totalorder %s1837_s9, 0 }
  0xcd   : > { %s1703_s2 = sand.u32 (!%p1855_p5), 1, %s1319_s22   ;;  %p1856_p13 = scmp.ne.s32.totalorder (!%p1855_p5), %s1834_s7, 0 }
  0xce   : > { %966 = dma.hbm_to_vmem [thread:$0]  (!%p1854_p11), %s1680_s14, 16, %s328_s15, %s316_s3  }
  0xcf   : > { %336 = sbr.rel (%p1855_p5) target bundleno = 477 (0x1dd), region = 44  ;;  %s859_s13 = sshll.u32 (!%p1855_p5), %s1703_s2, 2 }
  0xd0   : > { %s339_s17 = scalar_lea.sflag (!%p1855_p5), [#allocation3], %s1703_s2  ;;  %s342_s16 = scalar_lea.vmem (!%p1855_p5), [#allocation2], %s859_s13 }
  0xd6   : > { %1290 = dma.done.wait (%p1856_p13), %s339_s17, 64  }
  0xd7   : > { %1292 = vsyncadd (%p1856_p13), %s339_s17, 4294967232  ;;  %s347_s9 = sand.u32 1, %s1435_s29   ;;  %s860_s24 = sshll.u32 %s1703_s2, 5 }
  0xd8   : > { %s348_s15 = scalar_lea.sflag [#allocation6], %s347_s9  ;;  %s351_s14 = scalar_lea.vmem [#allocation5], %s860_s24 }
  0xd9   : > { %1294 = dma.done.wait (%p1856_p13), %s348_s15, 512  }
  0xda   : > { %1296 = vsyncadd (%p1856_p13), %s348_s15, 4294966784  ;;  %p1857_p9 = scmp.eq.s32.totalorder %s1435_s29, 0 }
  0xdc   : > { %1298 = dma.done.wait (%p1857_p9), [#allocation6], 512   ;;  %p1858_p1 = pmov %p1857_p9 }
  0xde   : > { %1300 = vsyncadd (%p1858_p1), [#allocation6], 4294966784  ;;  %p1859_p4 = pmov %p1858_p1 }
  0xdf   : > { %p1860_p8 = pmov %p1858_p1 }
  0xe0   : > { %1302 = dma.done.wait (%p1859_p4), [#allocation9], 1024  }
  0xe1   : > { %1304 = vsyncadd (%p1860_p8), [#allocation9], 4294966272  ;;  %s369_s3 = scalar_lea.sflag [#allocation12], %s1703_s2  ;;  %s371_s30 = scalar_lea.vmem [#allocation11], %s1703_s2 }
  0xe2   : > { %1306 = dma.done.wait (%p1856_p13), %s369_s3, 16  }
  0xe3   : > { %1308 = vsyncadd (%p1856_p13), %s369_s3, 4294967280  ;;  %v1354_v0 = vmov 0   ;;  %vm533_vm0 = vcmask 1043456   ;;  %vm520_vm1 = vcmask 31744   ;;  %v418_v1 = vld [vmem:[%s351_s14] sm:$0xff]  ;;  %v419_v2 = vld [vmem:[%s351_s14 + $0x8] sm:$0xff] }
  0xe4   : > { %1053 = vset.pattern.permute.xlu0 %v1354_v0  ;;  %1054 = vset.pattern.permute.xlu1 %v1354_v0  ;;  %v420_v3 = vld [vmem:[%s351_s14 + $0x10] sm:$0xff]  ;;  %v915_v4 = vpack.c.bf16 %v419_v2, %v418_v1  ;;  %v421_v5 = vld [vmem:[%s351_s14 + $0x18] sm:$0xff]  ;;  %v409_v7 = vld [vmem:[#allocation7] sm:$0xff]  ;;  %vm422_vm2 = vcmask 261120   ;;  %s1861_s29 = sld [smem:[#allocation21_spill]]  ;;  %s876_s7 = sshll.u32 %s1331_s25, 3 }
  0xe5   : > { %v413_v6 = vld [vmem:[%s342_s16] sm:$0xf]  ;;  %v919_v8 = vpack.c.bf16 %v421_v5, %v420_v3  ;;  %909 = vmatprep.mubr.msk.f32.mxu0 %vm520_vm1, %v409_v7  ;;  %v414_v9 = vld [vmem:[#allocation8] sm:$0xff]  ;;  %v410_v10 = vld [vmem:[#allocation7 + $0x8] sm:$0xff]  ;;  %s408_s10 = scalar_lea.vmem [#allocation13], %s860_s24  ;;  %s1862_s20 = sld [smem:[#allocation29_spill]] }
  0xe6   : > { %907 = vmatprep.subr.msk.mxu0 %vm533_vm0, %v413_v6  ;;  %916 = vmatprep.subr.bf16.mxu1 %v915_v4  ;;  %v411_v11 = vld [vmem:[#allocation7 + $0x10] sm:$0xff]  ;;  %v622_v12 = vld [vmem:[#allocation10] sm:$0xff]  ;;  %v412_v14 = vld [vmem:[#allocation7 + $0x18] sm:$0xff]  ;;  %s680_s11 = sshll.u32 %s408_s10, 4  ;;  %s666_s4 = scalar_lea.sflag [#allocation4], %s1703_s2  ;;  %s1749_s11 = int_to_ptr.vmem [resolvable:$true] %s680_s11 }
  0xe7   : > { %908 = vmatpush3.msk.msra.mxu0 %vm533_vm0, %v413_v6  ;;  %918 = vmatpush3.bf16.msra.mxu1 %v915_v4  ;;  %v624_v13 = vld [vmem:[#allocation10 + $0x10] sm:$0xff]  ;;  %v623_v15 = vld [vmem:[#allocation10 + $0x8] sm:$0xff]  ;;  %v625_v17 = vld [vmem:[#allocation10 + $0x18] sm:$0xff]  ;;  %s1229_s6 = scalar_lea.vmem %s1749_s11, 512  ;;  %p1863_p2 = scmp.ne.s32.totalorder %s1845_s8, 0 }
  0xe8   : > { %901 = vmatprep.mubr.msk.f32.mxu1 %vm422_vm2, %v414_v9  ;;  %920 = vmatprep.subr.bf16.mxu1 %v919_v8  ;;  %v415_v16 = vld [vmem:[#allocation8 + $0x8] sm:$0xff]  ;;  %v416_v18 = vld [vmem:[#allocation8 + $0x10] sm:$0xff]  ;;  %v417_v19 = vld [vmem:[#allocation8 + $0x18] sm:$0xff]  ;;  %p1230_p3 = scmp.ne.s32.totalorder %s1749_s11, %s1229_s6  ;;  %s1355_s13 = smov [#allocation13]  }
  0xe9   : > { %910 = vmatmul.mubr.msk.f32.vlgmr.msra.gmra.mrb[0].mxu0 %vm520_vm1, %v410_v10  ;;  %628 = vperm.xlu0 %1053, %v622_v12   ;;  %v874_v31 = vld [vmem:[%s371_s30] ss:$0 sm:$0xff]  ;;  %s1233_s17 = sshll.u32 %s1355_s13, 4  ;;  %s1234_s17 = int_to_ptr.vmem [resolvable:$false] %s1233_s17 }
  0xea   : > { %912 = vmatprep.mubr.msk.f32.mxu0 %vm520_vm1, %v411_v11  ;;  %638 = vperm.xlu1 %1054, %v624_v13   ;;  %s677_s0 = sadd.s32 %s1861_s29, %s876_s7  ;;  %p1231_p6 = pnand %p1230_p3, %p1863_p2 }
  0xeb   : > { %922 = vmatpush3.bf16.msra.mxu1 %v919_v8  ;;  %s877_s25 = sshll.u32 %s677_s0, 7  ;;  %s1235_s16 = scalar_lea.vmem %s1234_s17, 1024 }
  0xec   : > { %s1754_s19 = scalar_lea.hbm %s1862_s20, %s877_s25  ;;  %p1232_p0 = pneg %p1231_p6 }
  0xed   : > { %913 = vmatmul.mubr.msk.f32.gmra.mrb[2].mxu0 %vm520_vm1, %v412_v14  ;;  %633 = vperm.xlu0 %1053, %v623_v15   ;;  %p1236_p12 = scmp.lt.s32.totalorder %s1749_s11, %s1234_s17  ;;  %p1237_p10 = scmp.lt.s32.totalorder %s1235_s16, %s1229_s6 }
  0xee   : > { %902 = vmatmul.mubr.msk.f32.vlgmr.msra.gmra.mrb[0].mxu1 %vm422_vm2, %v415_v16  ;;  %643 = vperm.xlu1 %1054, %v625_v17  }
  0xef   : > { %904 = vmatprep.mubr.msk.f32.mxu1 %vm422_vm2, %v416_v18  ;;  %p1238_p7 = por %p1237_p10, %p1236_p12 }
  0xf1   : > { %p1239_p11 = pnand %p1238_p7, %p1232_p0 }
  0xf2   : > { %905 = vmatmul.mubr.msk.f32.gmra.mrb[2].mxu1 %vm422_vm2, %v417_v19 }
 0x168   : > { %v629_v20 = vpop.permute.xlu0 %628 }
 0x169   : > { %v639_v24 = vpop.permute.xlu1 %638 }
 0x16c   : > { %v634_v27 = vpop.permute.xlu0 %633 }
 0x16d   : > { %v644_v39 = vpop.permute.xlu1 %643 }
 0x1bc   : > { %v911_v21 = vpop.f32.mrb[0].mxu0 }
 0x1bd   : > { %v603_v22 = vpop.f32.mrb[1].mxu0 }
 0x1c0   : > { %v914_v23 = vpop.f32.mrb[2].mxu0 }
 0x1c1   : > { %v613_v25 = vpop.f32.mrb[3].mxu0  ;;  %v903_v26 = vpop.f32.mrb[0].mxu1 }
 0x1c2   : > { %v609_v28 = vadd.f32 %v911_v21, %v903_v26  ;;  %v501_v29 = vpop.f32.mrb[1].mxu1 }
 0x1c3   : > { %v604_v30 = vadd.f32 %v603_v22, %v501_v29 }
 0x1c4   : > { %v647_v32 = vadd.f32 %v634_v27, %v609_v28 }
 0x1c5   : > { %v646_v33 = vadd.f32 %v629_v20, %v604_v30  ;;  %v906_v34 = vpop.f32.mrb[2].mxu1 }
 0x1c6   : > { %v658_v35 = vmul.f32 %v874_v31, %v647_v32  ;;  %v619_v36 = vadd.f32 %v914_v23, %v906_v34  ;;  %v511_v37 = vpop.f32.mrb[3].mxu1 }
 0x1c7   : > { %v657_v38 = vmul.f32 %v874_v31, %v646_v33  ;;  %v614_v40 = vadd.f32 %v613_v25, %v511_v37 }
 0x1c8   : > { %662 = vst [vmem:[%s408_s10 + $0x8] sm:$0xff] %v658_v35  ;;  %v649_v41 = vadd.f32 %v644_v39, %v619_v36 }
 0x1c9   : > { %661 = vst [vmem:[%s408_s10] sm:$0xff] %v657_v38  ;;  %v648_v42 = vadd.f32 %v639_v24, %v614_v40 }
 0x1ca   : > { %v660_v43 = vmul.f32 %v874_v31, %v649_v41 }
 0x1cb   : > { %v659_v44 = vmul.f32 %v874_v31, %v648_v42 }
 0x1cc   : > { %664 = vst [vmem:[%s408_s10 + $0x18] sm:$0xff] %v660_v43 }
 0x1cd   : > { %663 = vst [vmem:[%s408_s10 + $0x10] sm:$0xff] %v659_v44 }
 0x1ce   : > { %1242 = shalt.err (!%p1239_p11)
}
 0x1cf   : > { %s1243_s9 = scalar_lea.hbm %s1754_s19, 512  ;;  %s1247_s14 = scalar_lea.hbm %s1862_s20, 2048 }
 0x1d0   : > { %p1244_p5 = scmp.ne.s32.totalorder %s1754_s19, %s1243_s9  ;;  %p1248_p1 = scmp.lt.u32.totalorder %s1754_s19, %s1862_s20 }
 0x1d1   : > { %p1249_p4 = scmp.lt.u32.totalorder %s1247_s14, %s1243_s9  ;;  %p1251_p3 = scmp.lt.u32.totalorder %s1243_s9, %s1754_s19 }
 0x1d2   : > { %p1245_p13 = pnand %p1244_p5, %p1863_p2 }
 0x1d3   : > { %p1250_p8 = por %p1249_p4, %p1248_p1 }
 0x1d4   : > { %p1246_p9 = pneg %p1245_p13 }
 0x1d5   : > { %p1252_p6 = por %p1251_p3, %p1250_p8 }
 0x1d7   : > { %p1253_p0 = pnand %p1252_p6, %p1246_p9 }
 0x1d9   : > { %1256 = shalt.err (!%p1253_p0)
}
 0x1da   : > { %s1356_s29 = smov 128   ;;  %s1357_s7 = smov 256  }
 0x1db   : > { %s1358_s0 = smov 8  }
 0x1dc   : > { %945 = dma.vmem_to_hbm [thread:$0]  (%p1863_p2), %s1749_s11, 512, %s1754_s19, %s666_s4, %s1356_s29, %s1357_s7, %s1358_s0  }
 0x1dd PF: > { %s1864_s10 = sld [smem:[#allocation20_spill]]  ;;  %s1865_s25 = sld [smem:[#allocation22_spill]] }
 0x1de   : > { %p978_p12 = scmp.ge.s32.totalorder %s1343_s28, 2 }
 0x1e3   : > { %s695_s21 = sand.u32 1, %s1864_s10   ;;  %p1866_p10 = scmp.ne.s32.totalorder %s1865_s25, 0 }
 0x1e4   : > { %s696_s12 = scalar_lea.sflag [#allocation4], %s695_s21 }
 0x1e5   : > { %p968_p7 = pnand %p978_p12, %p1866_p10 }
 0x1e7   : > { %1310 = dma.done.wait (!%p968_p7), %s696_s12, 512  }
 0x1e8   : > { %1312 = vsyncadd (!%p968_p7), %s696_s12, 4294966784  ;;  %s29_s28 = sadd.s32 1, %s1343_s28   ;;  %s1867_s8 = sld [smem:[#allocation23_spill]] }
 0x1e9   : > { %p26_p11 = scmp.ge.s32.totalorder %s29_s28, 6   ;;  %s1868_s2 = sld [smem:[#allocation24_spill]] }
 0x1ea   : > { %s1869_s21 = smov %s1319_s22  ;;  %s1870_s22 = smov %s1323_s23 }
 0x1eb   : > { %s1871_s23 = smov %s1587_s18  ;;  %s1872_s24 = smov %s1335_s26 }
 0x1ec   : > { %s1873_s25 = smov %s1339_s27  ;;  %28 = sbr.rel (!%p26_p11) target bundleno = 18 (0x12), region = 127 }
 0x1ee   : > { %s1874_s26 = smov %s1867_s8 }
 0x1ef   : > { %s1875_s27 = smov %s1868_s2 }
 0x1f3   :  { %701 = vsyncpa [#allocation3], 1 }
 0x1f4   :  { %703 = vsyncpa [#allocation3 + $0x1], 1 }
 0x1f5   :  { %704 = vsyncpa [#allocation6], 1 }
 0x1f6   :  { %706 = vsyncpa [#allocation6 + $0x1], 1 }
 0x1f7   :  { %707 = vsyncpa [#allocation9], 1 }
 0x1f8   :  { %708 = vsyncpa [#allocation12], 1 }
 0x1f9   :  { %710 = vsyncpa [#allocation12 + $0x1], 1 }
 0x1fa   :  { %711 = vsyncpa [#allocation4], 1 }
 0x1fb   :  { %713 = vsyncpa [#allocation4 + $0x1], 1 }

</bundles_post_ra>
